<compile_context>
chip_gen: v7x
topology: tpu7x:2x2x1
jax: 0.10.0
libtpu: 0.0.40
codegen_flags: <defaults>
</compile_context>

<pallas_src>
import functools
import math

import jax
import jax.numpy as jnp
from jax.experimental import pallas as pl
from jax.experimental.pallas import tpu as pltpu


VMEM_LIMIT_BYTES = 32 * 1024 * 1024  # conservative; fits v5e/v6e (128 MiB) and v7x (64 MiB)


def _round_up(x, m):
    return ((x + m - 1) // m) * m


# ----------------------------------------------------------------------------
# Kernel 1: tiled matmul + bias (+ReLU)   out = act(A @ W + b)
#   grid = (M/tm, N/tn, K/tk), f32 accumulator scratch, pl.when init/finalize.
# ----------------------------------------------------------------------------
def _matmul_bias_act_kernel(a_ref, w_ref, b_ref, o_ref, acc_ref, *, relu):
    @pl.when(pl.program_id(2) == 0)
    def _init():
        acc_ref[...] = jnp.zeros_like(acc_ref)

    acc_ref[...] += jnp.dot(a_ref[...], w_ref[...],
                            preferred_element_type=jnp.float32)

    @pl.when(pl.program_id(2) == pl.num_programs(2) - 1)
    def _finalize():
        r = acc_ref[...] + b_ref[...]          # epilogue in f32
        if relu:
            r = jnp.maximum(r, 0.0)
        o_ref[...] = r.astype(o_ref.dtype)


def matmul_bias_act(a, w, b, *, relu, out_dtype,
                    tm_max=256, tn_max=512, tk_max=1024):
    """a: [M, K] bf16, w: [K, N] bf16 (pre-prepped), b: [1, N] f32."""
    M, K = a.shape
    Kw, N = w.shape
    assert K == Kw and b.shape == (1, N)

    def tile(dim, tmax):
        # Full-extent block when small (no padding / slicing needed);
        # otherwise a hardware-aligned tile with padding.
        if dim <= tmax:
            return dim, dim
        return tmax, _round_up(dim, tmax)

    tm, Mp = tile(M, tm_max)
    tn, Np = tile(N, tn_max)
    tk, Kp = tile(K, tk_max)

    a_p = a if (Mp, Kp) == (M, K) else (
        jnp.zeros((Mp, Kp), a.dtype).at[:M, :K].set(a))
    w_p = w if (Kp, Np) == (K, N) else (
        jnp.zeros((Kp, Np), w.dtype).at[:K, :N].set(w))
    b_p = b if Np == N else jnp.zeros((1, Np), b.dtype).at[:, :N].set(b)

    grid = (Mp // tm, Np // tn, Kp // tk)
    out_bytes = Mp * Np * jnp.dtype(out_dtype).itemsize
    bytes_accessed = (a_p.size * a_p.dtype.itemsize
                      + w_p.size * w_p.dtype.itemsize
                      + b_p.size * b_p.dtype.itemsize
                      + out_bytes)

    out = pl.pallas_call(
        functools.partial(_matmul_bias_act_kernel, relu=relu),
        out_shape=jax.ShapeDtypeStruct((Mp, Np), out_dtype),
        grid=grid,
        in_specs=[
            pl.BlockSpec((tm, tk), lambda i, j, k: (i, k)),
            pl.BlockSpec((tk, tn), lambda i, j, k: (k, j)),
            pl.BlockSpec((1, tn), lambda i, j, k: (0, j)),
        ],
        out_specs=pl.BlockSpec((tm, tn), lambda i, j, k: (i, j)),
        scratch_shapes=[pltpu.VMEM((tm, tn), jnp.float32)],
        compiler_params=pltpu.CompilerParams(
            dimension_semantics=("parallel", "parallel", "arbitrary"),
            vmem_limit_bytes=VMEM_LIMIT_BYTES),
        cost_estimate=pl.CostEstimate(
            flops=2 * Mp * Np * Kp, transcendentals=0,
            bytes_accessed=bytes_accessed),
    )(a_p, w_p, b_p)

    if (Mp, Np) != (M, N):
        out = out[:M, :N]
    return out


# ----------------------------------------------------------------------------
# Kernel 2: fused chain of linear layers  h = act_l(h @ W_l + b_l)
#   One pallas_call; weights resident in VMEM; hidden activations never touch
#   HBM.  Used for conv3(+flatten)+FC1+FC2 (when conv3 output is 1x1) or
#   FC1+FC2 otherwise.  Grid tiles only M ("parallel").
# ----------------------------------------------------------------------------
def _fused_chain_kernel(x_ref, *refs, relus):
    n = len(relus)
    o_ref = refs[2 * n]
    h = x_ref[...]                              # bf16 [tm, K0]
    for l in range(n):
        w = refs[2 * l][...]                    # bf16 [Kl, Nl]
        b = refs[2 * l + 1][...]                # f32  [1, Nl]
        acc = jnp.dot(h.astype(w.dtype), w,
                      preferred_element_type=jnp.float32) + b
        if relus[l]:
            acc = jnp.maximum(acc, 0.0)
        h = acc if l == n - 1 else acc.astype(jnp.bfloat16)
    o_ref[...] = h.astype(o_ref.dtype)


def fused_chain(x, layers, relus, out_dtype=jnp.float32, tm_max=256):
    """x: [M, K0] bf16; layers: list of (W [K,N] bf16, b [1,N] f32)."""
    M, K0 = x.shape
    n_out = layers[-1][0].shape[1]

    if M <= tm_max:
        tm, Mp = M, M
    else:
        tm = tm_max
        Mp = _round_up(M, tm)
    x_p = x if Mp == M else jnp.zeros((Mp, K0), x.dtype).at[:M].set(x)

    in_specs = [pl.BlockSpec((tm, K0), lambda i: (i, 0))]
    operands = [x_p]
    flops = 0
    bytes_accessed = x_p.size * x_p.dtype.itemsize
    for (w, b) in layers:
        kw, nw = w.shape
        in_specs.append(pl.BlockSpec((kw, nw), lambda i: (0, 0)))
        in_specs.append(pl.BlockSpec((1, nw), lambda i: (0, 0)))
        operands += [w, b]
        flops += 2 * Mp * kw * nw
        bytes_accessed += w.size * w.dtype.itemsize + b.size * b.dtype.itemsize
    bytes_accessed += Mp * n_out * jnp.dtype(out_dtype).itemsize

    out = pl.pallas_call(
        functools.partial(_fused_chain_kernel, relus=tuple(relus)),
        out_shape=jax.ShapeDtypeStruct((Mp, n_out), out_dtype),
        grid=(Mp // tm,),
        in_specs=in_specs,
        out_specs=pl.BlockSpec((tm, n_out), lambda i: (i, 0)),
        compiler_params=pltpu.CompilerParams(
            dimension_semantics=("parallel",),
            vmem_limit_bytes=VMEM_LIMIT_BYTES),
        cost_estimate=pl.CostEstimate(
            flops=flops, transcendentals=0, bytes_accessed=bytes_accessed),
    )(*operands)

    return out if Mp == M else out[:M]


# ----------------------------------------------------------------------------
# im2col (NHWC, (kh, kw, c) patch ordering) + conv-as-matmul wrapper
# ----------------------------------------------------------------------------
def _extract_patches_nhwc(x, k, s):
    """x: [B, H, W, C] -> patches [B*OH*OW, k*k*C] ordered (kh, kw, c)."""
    B, H, W, C = x.shape
    OH = (H - k) // s + 1
    OW = (W - k) // s + 1
    rows = []
    for di in range(k):
        cols = []
        for dj in range(k):
            cols.append(x[:, di:di + s * (OH - 1) + 1:s,
                          dj:dj + s * (OW - 1) + 1:s, :])   # [B, OH, OW, C]
        rows.append(jnp.stack(cols, axis=3))                # [B, OH, OW, k, C]
    patches = jnp.stack(rows, axis=3)                       # [B, OH, OW, k, k, C]
    return patches.reshape(B * OH * OW, k * k * C), OH, OW


def conv2d_relu_nhwc(x, layer, *, k, s):
    """x: [B, H, W, Cin] bf16; layer = (W_mat [k*k*Cin, Cout] bf16, b [1,Cout] f32)."""
    w_mat, b = layer
    B = x.shape[0]
    patches, OH, OW = _extract_patches_nhwc(x, k, s)
    out = matmul_bias_act(patches, w_mat, b, relu=True, out_dtype=jnp.bfloat16)
    return out.reshape(B, OH, OW, w_mat.shape[1])           # stays NHWC


# ----------------------------------------------------------------------------
# Parameter init (PyTorch-default-like) + one-time preprocessing
# ----------------------------------------------------------------------------
def init_params(key, input_shape, n_actions):
    C, H, W = input_shape

    def u(key, shape, fan_in):
        bound = 1.0 / math.sqrt(fan_in)
        return jax.random.uniform(key, shape, jnp.float32, -bound, bound)

    keys = jax.random.split(key, 10)
    p = {}
    p["conv1_w"] = u(keys[0], (32, C, 8, 8), C * 8 * 8)
    p["conv1_b"] = u(keys[1], (32,), C * 8 * 8)
    p["conv2_w"] = u(keys[2], (64, 32, 4, 4), 32 * 4 * 4)
    p["conv2_b"] = u(keys[3], (64,), 32 * 4 * 4)
    p["conv3_w"] = u(keys[4], (64, 64, 3, 3), 64 * 3 * 3)
    p["conv3_b"] = u(keys[5], (64,), 64 * 3 * 3)

    h1, w1 = (H - 8) // 4 + 1, (W - 8) // 4 + 1
    h2, w2 = (h1 - 4) // 2 + 1, (w1 - 4) // 2 + 1
    h3, w3 = h2 - 2, w2 - 2
    conv_out_size = 64 * h3 * w3

    p["fc1_w"] = u(keys[6], (512, conv_out_size), conv_out_size)
    p["fc1_b"] = u(keys[7], (512,), conv_out_size)
    p["fc2_w"] = u(keys[8], (n_actions, 512), 512)
    p["fc2_b"] = u(keys[9], (n_actions,), 512)
    return p


def prepare_params(params, input_shape):
    """One-time weight prep: matmul layout, NHWC ordering, bf16 cast.
    Hoisted out of the forward path (no per-call weight reshapes/transposes)."""
    C, H, W = input_shape

    def conv_prep(w, b):
        cout, cin, k, _ = w.shape
        # rows ordered (kh, kw, cin) to match _extract_patches_nhwc
        w_mat = w.transpose(2, 3, 1, 0).reshape(k * k * cin, cout)
        return w_mat.astype(jnp.bfloat16), b.reshape(1, cout).astype(jnp.float32)

    prep = {
        "conv1": conv_prep(params["conv1_w"], params["conv1_b"]),
        "conv2": conv_prep(params["conv2_w"], params["conv2_b"]),
        "conv3": conv_prep(params["conv3_w"], params["conv3_b"]),
    }

    h1, w1 = (H - 8) // 4 + 1, (W - 8) // 4 + 1
    h2, w2 = (h1 - 4) // 2 + 1, (w1 - 4) // 2 + 1
    h3, w3 = h2 - 2, w2 - 2
    # PyTorch flattens NCHW (c, h, w); we flatten NHWC (h, w, c).  Reorder the
    # FC1 weight columns once here so no activation transpose is needed.
    fc1_w = params["fc1_w"].reshape(512, 64, h3, w3).transpose(0, 2, 3, 1)
    fc1_w = fc1_w.reshape(512, -1).T                      # [h3*w3*64, 512]
    prep["fc1"] = (fc1_w.astype(jnp.bfloat16),
                   params["fc1_b"].reshape(1, 512).astype(jnp.float32))
    prep["fc2"] = (params["fc2_w"].T.astype(jnp.bfloat16),
                   params["fc2_b"].reshape(1, -1).astype(jnp.float32))
    return prep


# ----------------------------------------------------------------------------
# DQN forward
# ----------------------------------------------------------------------------
def dqn_forward(prep, x):
    """x: [B, C, H, W] f32 (NCHW, like PyTorch). Returns [B, n_actions] f32."""
    # Single layout conversion + bf16 cast at the network input.
    x = jnp.transpose(x, (0, 2, 3, 1)).astype(jnp.bfloat16)      # NHWC
    x = conv2d_relu_nhwc(x, prep["conv1"], k=8, s=4)
    x = conv2d_relu_nhwc(x, prep["conv2"], k=4, s=2)
    B, H2, W2, C2 = x.shape
    if H2 == 3 and W2 == 3:
        # conv3 (k=3, s=1) sees exactly one window -> it is a pure linear layer
        # on the flattened conv2 output: fuse conv3 + FC1 + FC2 in ONE kernel.
        feats = x.reshape(B, H2 * W2 * C2)                       # (h, w, c) order
        return fused_chain(feats,
                           [prep["conv3"], prep["fc1"], prep["fc2"]],
                           relus=(True, True, False))
    # General case: conv3 via im2col matmul, then fused FC1+FC2 head.
    x = conv2d_relu_nhwc(x, prep["conv3"], k=3, s=1)
    feats = x.reshape(x.shape[0], -1)                            # (h, w, c) order
    return fused_chain(feats, [prep["fc1"], prep["fc2"]], relus=(True, False))


# Pure-JAX f32 reference (mirrors the PyTorch module exactly).
def dqn_forward_ref(params, x):
    def conv(x, w, b, s):
        y = jax.lax.conv_general_dilated(
            x, w, window_strides=(s, s), padding="VALID",
            dimension_numbers=("NCHW", "OIHW", "NCHW"))
        return jnp.maximum(y + b[None, :, None, None], 0.0)

    x = conv(x, params["conv1_w"], params["conv1_b"], 4)
    x = conv(x, params["conv2_w"], params["conv2_b"], 2)
    x = conv(x, params["conv3_w"], params["conv3_b"], 1)
    x = x.reshape(x.shape[0], -1)
    x = jnp.maximum(x @ params["fc1_w"].T + params["fc1_b"], 0.0)
    return x @ params["fc2_w"].T + params["fc2_b"]


if __name__ == "__main__":
    # Smallest input consistent with the conv stack (k8/s4 -> k4/s2 -> k3/s1):
    # 36x36 gives 8x8 -> 3x3 -> 1x1 feature maps (so the conv3+FC fusion path
    # is exercised).
    B, C, H, W = 2, 4, 36, 36
    n_actions = 6

    key = jax.random.PRNGKey(0)
    pkey, xkey = jax.random.split(key)
    params = init_params(pkey, (C, H, W), n_actions)
    prep = prepare_params(params, (C, H, W))
    x = jax.random.normal(xkey, (B, C, H, W), jnp.float32)

    fwd = jax.jit(dqn_forward)
    out = jax.block_until_ready(fwd(prep, x))
    assert out.shape == (B, n_actions), out.shape

    ref = dqn_forward_ref(params, x)
    err = float(jnp.max(jnp.abs(out - ref)))
    # bf16 MXU inputs (f32 accumulation) -> looser tolerance than pure f32.
    assert err < 2e-2, err

    print("KERNEL_OK")
</pallas_src>

<mosaic_0001>
module attributes {stable_mosaic.version = 11 : i64} {
  func.func @_matmul_bias_act_kernel(%arg0: i32, %arg1: i32, %arg2: i32, %arg3: memref<128x256xbf16, #tpu.memory_space<vmem>>, %arg4: memref<256x32xbf16, #tpu.memory_space<vmem>>, %arg5: memref<1x32xf32, #tpu.memory_space<vmem>>, %arg6: memref<128x32xbf16, #tpu.memory_space<vmem>>, %arg7: memref<128x32xf32, #tpu.memory_space<vmem>>) attributes {dimension_semantics = [#tpu.dimension_semantics<parallel>, #tpu.dimension_semantics<parallel>, #tpu.dimension_semantics<arbitrary>], iteration_bounds = array<i64: 1, 1, 1>, scalar_prefetch = 0 : i64, scratch_operands = 1 : i64, tpu.core_type = #tpu.core_type<tc>, window_params = [{transform_indices = @transform_0, window_bounds = array<i64: 128, 256>}, {transform_indices = @transform_1, window_bounds = array<i64: 256, 32>}, {transform_indices = @transform_2, window_bounds = array<i64: 1, 32>}, {transform_indices = @transform_3, window_bounds = array<i64: 128, 32>}]} {
    %c0_i32 = arith.constant 0 : i32
    %0 = arith.cmpi eq, %arg2, %c0_i32 : i32
    %1 = arith.extui %0 : i1 to i32
    %c0_i32_0 = arith.constant 0 : i32
    %2 = arith.cmpi ne, %1, %c0_i32_0 : i32
    scf.if %2 {
      %cst_10 = arith.constant 0.000000e+00 : f32
      %12 = vector.broadcast %cst_10 : f32 to vector<128x32xf32>
      %c0_11 = arith.constant 0 : index
      %c0_12 = arith.constant 0 : index
      %13 = vector.load %arg7[%c0_11, %c0_12] : memref<128x32xf32, #tpu.memory_space<vmem>>, vector<128x32xf32>
      tpu.vector_store %arg7[%c0_11, %c0_12], %12 {strides = array<i32>} : memref<128x32xf32, #tpu.memory_space<vmem>>, vector<128x32xf32>,
    } else {
    }
    %c0 = arith.constant 0 : index
    %c0_1 = arith.constant 0 : index
    %3 = vector.load %arg7[%c0, %c0_1] : memref<128x32xf32, #tpu.memory_space<vmem>>, vector<128x32xf32>
    %c0_2 = arith.constant 0 : index
    %c0_3 = arith.constant 0 : index
    %4 = vector.load %arg3[%c0_2, %c0_3] : memref<128x256xbf16, #tpu.memory_space<vmem>>, vector<128x256xbf16>
    %c0_4 = arith.constant 0 : index
    %c0_5 = arith.constant 0 : index
    %5 = vector.load %arg4[%c0_4, %c0_5] : memref<256x32xbf16, #tpu.memory_space<vmem>>, vector<256x32xbf16>
    %cst = arith.constant dense<0.000000e+00> : vector<128x32xf32>
    %6 = tpu.matmul %4, %5, %cst {dimension_numbers = #tpu.dot_dimension_numbers<[1], [0], [0], [1], [0, 0, 1, 1], [], []>} : vector<128x256xbf16>, vector<256x32xbf16>, vector<128x32xf32> -> vector<128x32xf32>
    %7 = arith.addf %3, %6 : vector<128x32xf32>
    %c0_6 = arith.constant 0 : index
    %c0_7 = arith.constant 0 : index
    %8 = vector.load %arg7[%c0_6, %c0_7] : memref<128x32xf32, #tpu.memory_space<vmem>>, vector<128x32xf32>
    tpu.vector_store %arg7[%c0_6, %c0_7], %7 {strides = array<i32>} : memref<128x32xf32, #tpu.memory_space<vmem>>, vector<128x32xf32>,
    %c0_i32_8 = arith.constant 0 : i32
    %9 = arith.cmpi eq, %arg2, %c0_i32_8 : i32
    %10 = arith.extui %9 : i1 to i32
    %c0_i32_9 = arith.constant 0 : i32
    %11 = arith.cmpi ne, %10, %c0_i32_9 : i32
    scf.if %11 {
      %c0_10 = arith.constant 0 : index
      %c0_11 = arith.constant 0 : index
      %12 = vector.load %arg7[%c0_10, %c0_11] : memref<128x32xf32, #tpu.memory_space<vmem>>, vector<128x32xf32>
      %c0_12 = arith.constant 0 : index
      %c0_13 = arith.constant 0 : index
      %13 = vector.load %arg5[%c0_12, %c0_13] : memref<1x32xf32, #tpu.memory_space<vmem>>, vector<1x32xf32>
      %14 = vector.broadcast %13 : vector<1x32xf32> to vector<128x32xf32>
      %15 = arith.addf %12, %14 : vector<128x32xf32>
      %cst_14 = arith.constant 0.000000e+00 : f32
      %16 = vector.broadcast %cst_14 : f32 to vector<128x32xf32>
      %17 = arith.maximumf %15, %16 : vector<128x32xf32>
      %18 = arith.truncf %17 : vector<128x32xf32> to vector<128x32xbf16>
      %c0_15 = arith.constant 0 : index
      %c0_16 = arith.constant 0 : index
      %19 = vector.load %arg6[%c0_15, %c0_16] : memref<128x32xbf16, #tpu.memory_space<vmem>>, vector<128x32xbf16>
      tpu.vector_store %arg6[%c0_15, %c0_16], %18 {strides = array<i32>} : memref<128x32xbf16, #tpu.memory_space<vmem>>, vector<128x32xbf16>,
    } else {
    }
    return
  }
  func.func @transform_0(%arg0: i32, %arg1: i32, %arg2: i32) -> (i32, i32) {
    %c0_i32 = arith.constant 0 : i32
    return %arg0, %arg2 : i32, i32
  }
  func.func @transform_1(%arg0: i32, %arg1: i32, %arg2: i32) -> (i32, i32) {
    %c0_i32 = arith.constant 0 : i32
    return %arg2, %arg1 : i32, i32
  }
  func.func @transform_2(%arg0: i32, %arg1: i32, %arg2: i32) -> (i32, i32) {
    %c0_i32 = arith.constant 0 : i32
    %c0_i32_0 = arith.constant 0 : i32
    return %c0_i32, %arg1 : i32, i32
  }
  func.func @transform_3(%arg0: i32, %arg1: i32, %arg2: i32) -> (i32, i32) {
    %c0_i32 = arith.constant 0 : i32
    return %arg0, %arg1 : i32, i32
  }
}

module attributes {stable_mosaic.version = 11 : i64} {
  func.func @_matmul_bias_act_kernel(%arg0: i32, %arg1: i32, %arg2: i32, %arg3: memref<18x512xbf16, #tpu.memory_space<vmem>>, %arg4: memref<512x64xbf16, #tpu.memory_space<vmem>>, %arg5: memref<1x64xf32, #tpu.memory_space<vmem>>, %arg6: memref<18x64xbf16, #tpu.memory_space<vmem>>, %arg7: memref<18x64xf32, #tpu.memory_space<vmem>>) attributes {dimension_semantics = [#tpu.dimension_semantics<parallel>, #tpu.dimension_semantics<parallel>, #tpu.dimension_semantics<arbitrary>], iteration_bounds = array<i64: 1, 1, 1>, scalar_prefetch = 0 : i64, scratch_operands = 1 : i64, tpu.core_type = #tpu.core_type<tc>, window_params = [{transform_indices = @transform_0, window_bounds = array<i64: 18, 512>}, {transform_indices = @transform_1, window_bounds = array<i64: 512, 64>}, {transform_indices = @transform_2, window_bounds = array<i64: 1, 64>}, {transform_indices = @transform_3, window_bounds = array<i64: 18, 64>}]} {
    %c0_i32 = arith.constant 0 : i32
    %0 = arith.cmpi eq, %arg2, %c0_i32 : i32
    %1 = arith.extui %0 : i1 to i32
    %c0_i32_0 = arith.constant 0 : i32
    %2 = arith.cmpi ne, %1, %c0_i32_0 : i32
    scf.if %2 {
      %cst_10 = arith.constant 0.000000e+00 : f32
      %12 = vector.broadcast %cst_10 : f32 to vector<18x64xf32>
      %c0_11 = arith.constant 0 : index
      %c0_12 = arith.constant 0 : index
      %13 = vector.load %arg7[%c0_11, %c0_12] : memref<18x64xf32, #tpu.memory_space<vmem>>, vector<18x64xf32>
      tpu.vector_store %arg7[%c0_11, %c0_12], %12 {strides = array<i32>} : memref<18x64xf32, #tpu.memory_space<vmem>>, vector<18x64xf32>,
    } else {
    }
    %c0 = arith.constant 0 : index
    %c0_1 = arith.constant 0 : index
    %3 = vector.load %arg7[%c0, %c0_1] : memref<18x64xf32, #tpu.memory_space<vmem>>, vector<18x64xf32>
    %c0_2 = arith.constant 0 : index
    %c0_3 = arith.constant 0 : index
    %4 = vector.load %arg3[%c0_2, %c0_3] : memref<18x512xbf16, #tpu.memory_space<vmem>>, vector<18x512xbf16>
    %c0_4 = arith.constant 0 : index
    %c0_5 = arith.constant 0 : index
    %5 = vector.load %arg4[%c0_4, %c0_5] : memref<512x64xbf16, #tpu.memory_space<vmem>>, vector<512x64xbf16>
    %cst = arith.constant dense<0.000000e+00> : vector<18x64xf32>
    %6 = tpu.matmul %4, %5, %cst {dimension_numbers = #tpu.dot_dimension_numbers<[1], [0], [0], [1], [0, 0, 1, 1], [], []>} : vector<18x512xbf16>, vector<512x64xbf16>, vector<18x64xf32> -> vector<18x64xf32>
    %7 = arith.addf %3, %6 : vector<18x64xf32>
    %c0_6 = arith.constant 0 : index
    %c0_7 = arith.constant 0 : index
    %8 = vector.load %arg7[%c0_6, %c0_7] : memref<18x64xf32, #tpu.memory_space<vmem>>, vector<18x64xf32>
    tpu.vector_store %arg7[%c0_6, %c0_7], %7 {strides = array<i32>} : memref<18x64xf32, #tpu.memory_space<vmem>>, vector<18x64xf32>,
    %c0_i32_8 = arith.constant 0 : i32
    %9 = arith.cmpi eq, %arg2, %c0_i32_8 : i32
    %10 = arith.extui %9 : i1 to i32
    %c0_i32_9 = arith.constant 0 : i32
    %11 = arith.cmpi ne, %10, %c0_i32_9 : i32
    scf.if %11 {
      %c0_10 = arith.constant 0 : index
      %c0_11 = arith.constant 0 : index
      %12 = vector.load %arg7[%c0_10, %c0_11] : memref<18x64xf32, #tpu.memory_space<vmem>>, vector<18x64xf32>
      %c0_12 = arith.constant 0 : index
      %c0_13 = arith.constant 0 : index
      %13 = vector.load %arg5[%c0_12, %c0_13] : memref<1x64xf32, #tpu.memory_space<vmem>>, vector<1x64xf32>
      %14 = vector.broadcast %13 : vector<1x64xf32> to vector<18x64xf32>
      %15 = arith.addf %12, %14 : vector<18x64xf32>
      %cst_14 = arith.constant 0.000000e+00 : f32
      %16 = vector.broadcast %cst_14 : f32 to vector<18x64xf32>
      %17 = arith.maximumf %15, %16 : vector<18x64xf32>
      %18 = arith.truncf %17 : vector<18x64xf32> to vector<18x64xbf16>
      %c0_15 = arith.constant 0 : index
      %c0_16 = arith.constant 0 : index
      %19 = vector.load %arg6[%c0_15, %c0_16] : memref<18x64xbf16, #tpu.memory_space<vmem>>, vector<18x64xbf16>
      tpu.vector_store %arg6[%c0_15, %c0_16], %18 {strides = array<i32>} : memref<18x64xbf16, #tpu.memory_space<vmem>>, vector<18x64xbf16>,
    } else {
    }
    return
  }
  func.func @transform_0(%arg0: i32, %arg1: i32, %arg2: i32) -> (i32, i32) {
    %c0_i32 = arith.constant 0 : i32
    return %arg0, %arg2 : i32, i32
  }
  func.func @transform_1(%arg0: i32, %arg1: i32, %arg2: i32) -> (i32, i32) {
    %c0_i32 = arith.constant 0 : i32
    return %arg2, %arg1 : i32, i32
  }
  func.func @transform_2(%arg0: i32, %arg1: i32, %arg2: i32) -> (i32, i32) {
    %c0_i32 = arith.constant 0 : i32
    %c0_i32_0 = arith.constant 0 : i32
    return %c0_i32, %arg1 : i32, i32
  }
  func.func @transform_3(%arg0: i32, %arg1: i32, %arg2: i32) -> (i32, i32) {
    %c0_i32 = arith.constant 0 : i32
    return %arg0, %arg1 : i32, i32
  }
}

module attributes {stable_mosaic.version = 11 : i64} {
  func.func @_fused_chain_kernel(%arg0: i32, %arg1: memref<2x576xbf16, #tpu.memory_space<vmem>>, %arg2: memref<576x64xbf16, #tpu.memory_space<vmem>>, %arg3: memref<1x64xf32, #tpu.memory_space<vmem>>, %arg4: memref<64x512xbf16, #tpu.memory_space<vmem>>, %arg5: memref<1x512xf32, #tpu.memory_space<vmem>>, %arg6: memref<512x6xbf16, #tpu.memory_space<vmem>>, %arg7: memref<1x6xf32, #tpu.memory_space<vmem>>, %arg8: memref<2x6xf32, #tpu.memory_space<vmem>>) attributes {dimension_semantics = [#tpu.dimension_semantics<parallel>], iteration_bounds = array<i64: 1>, scalar_prefetch = 0 : i64, scratch_operands = 0 : i64, tpu.core_type = #tpu.core_type<tc>, window_params = [{transform_indices = @transform_0, window_bounds = array<i64: 2, 576>}, {pipeline_mode = #tpu.pipeline_mode<synchronous>, transform_indices = @transform_1, window_bounds = array<i64: 576, 64>}, {pipeline_mode = #tpu.pipeline_mode<synchronous>, transform_indices = @transform_2, window_bounds = array<i64: 1, 64>}, {pipeline_mode = #tpu.pipeline_mode<synchronous>, transform_indices = @transform_3, window_bounds = array<i64: 64, 512>}, {pipeline_mode = #tpu.pipeline_mode<synchronous>, transform_indices = @transform_4, window_bounds = array<i64: 1, 512>}, {pipeline_mode = #tpu.pipeline_mode<synchronous>, transform_indices = @transform_5, window_bounds = array<i64: 512, 6>}, {pipeline_mode = #tpu.pipeline_mode<synchronous>, transform_indices = @transform_6, window_bounds = array<i64: 1, 6>}, {transform_indices = @transform_7, window_bounds = array<i64: 2, 6>}]} {
    %c0 = arith.constant 0 : index
    %c0_0 = arith.constant 0 : index
    %0 = vector.load %arg1[%c0, %c0_0] : memref<2x576xbf16, #tpu.memory_space<vmem>>, vector<2x576xbf16>
    %c0_1 = arith.constant 0 : index
    %c0_2 = arith.constant 0 : index
    %1 = vector.load %arg2[%c0_1, %c0_2] : memref<576x64xbf16, #tpu.memory_space<vmem>>, vector<576x64xbf16>
    %c0_3 = arith.constant 0 : index
    %c0_4 = arith.constant 0 : index
    %2 = vector.load %arg3[%c0_3, %c0_4] : memref<1x64xf32, #tpu.memory_space<vmem>>, vector<1x64xf32>
    %cst = arith.constant dense<0.000000e+00> : vector<2x64xf32>
    %3 = tpu.matmul %0, %1, %cst {dimension_numbers = #tpu.dot_dimension_numbers<[1], [0], [0], [1], [0, 0, 1, 1], [], []>} : vector<2x576xbf16>, vector<576x64xbf16>, vector<2x64xf32> -> vector<2x64xf32>
    %4 = vector.broadcast %2 : vector<1x64xf32> to vector<2x64xf32>
    %5 = arith.addf %3, %4 : vector<2x64xf32>
    %cst_5 = arith.constant 0.000000e+00 : f32
    %6 = vector.broadcast %cst_5 : f32 to vector<2x64xf32>
    %7 = arith.maximumf %5, %6 : vector<2x64xf32>
    %8 = arith.truncf %7 : vector<2x64xf32> to vector<2x64xbf16>
    %c0_6 = arith.constant 0 : index
    %c0_7 = arith.constant 0 : index
    %9 = vector.load %arg4[%c0_6, %c0_7] : memref<64x512xbf16, #tpu.memory_space<vmem>>, vector<64x512xbf16>
    %c0_8 = arith.constant 0 : index
    %c0_9 = arith.constant 0 : index
    %10 = vector.load %arg5[%c0_8, %c0_9] : memref<1x512xf32, #tpu.memory_space<vmem>>, vector<1x512xf32>
    %cst_10 = arith.constant dense<0.000000e+00> : vector<2x512xf32>
    %11 = tpu.matmul %8, %9, %cst_10 {dimension_numbers = #tpu.dot_dimension_numbers<[1], [0], [0], [1], [0, 0, 1, 1], [], []>} : vector<2x64xbf16>, vector<64x512xbf16>, vector<2x512xf32> -> vector<2x512xf32>
    %12 = vector.broadcast %10 : vector<1x512xf32> to vector<2x512xf32>
    %13 = arith.addf %11, %12 : vector<2x512xf32>
    %cst_11 = arith.constant 0.000000e+00 : f32
    %14 = vector.broadcast %cst_11 : f32 to vector<2x512xf32>
    %15 = arith.maximumf %13, %14 : vector<2x512xf32>
    %16 = arith.truncf %15 : vector<2x512xf32> to vector<2x512xbf16>
    %c0_12 = arith.constant 0 : index
    %c0_13 = arith.constant 0 : index
    %17 = vector.load %arg6[%c0_12, %c0_13] : memref<512x6xbf16, #tpu.memory_space<vmem>>, vector<512x6xbf16>
    %c0_14 = arith.constant 0 : index
    %c0_15 = arith.constant 0 : index
    %18 = vector.load %arg7[%c0_14, %c0_15] : memref<1x6xf32, #tpu.memory_space<vmem>>, vector<1x6xf32>
    %cst_16 = arith.constant dense<0.000000e+00> : vector<2x6xf32>
    %19 = tpu.matmul %16, %17, %cst_16 {dimension_numbers = #tpu.dot_dimension_numbers<[1], [0], [0], [1], [0, 0, 1, 1], [], []>} : vector<2x512xbf16>, vector<512x6xbf16>, vector<2x6xf32> -> vector<2x6xf32>
    %20 = vector.broadcast %18 : vector<1x6xf32> to vector<2x6xf32>
    %21 = arith.addf %19, %20 : vector<2x6xf32>
    %c0_17 = arith.constant 0 : index
    %c0_18 = arith.constant 0 : index
    %22 = vector.load %arg8[%c0_17, %c0_18] : memref<2x6xf32, #tpu.memory_space<vmem>>, vector<2x6xf32>
    tpu.vector_store %arg8[%c0_17, %c0_18], %21 {strides = array<i32>} : memref<2x6xf32, #tpu.memory_space<vmem>>, vector<2x6xf32>,
    return
  }
  func.func @transform_0(%arg0: i32) -> (i32, i32) {
    %c0_i32 = arith.constant 0 : i32
    %c0_i32_0 = arith.constant 0 : i32
    return %arg0, %c0_i32 : i32, i32
  }
  func.func @transform_1(%arg0: i32) -> (i32, i32) {
    %c0_i32 = arith.constant 0 : i32
    %c0_i32_0 = arith.constant 0 : i32
    %c0_i32_1 = arith.constant 0 : i32
    return %c0_i32, %c0_i32_0 : i32, i32
  }
  func.func @transform_2(%arg0: i32) -> (i32, i32) {
    %c0_i32 = arith.constant 0 : i32
    %c0_i32_0 = arith.constant 0 : i32
    %c0_i32_1 = arith.constant 0 : i32
    return %c0_i32, %c0_i32_0 : i32, i32
  }
  func.func @transform_3(%arg0: i32) -> (i32, i32) {
    %c0_i32 = arith.constant 0 : i32
    %c0_i32_0 = arith.constant 0 : i32
    %c0_i32_1 = arith.constant 0 : i32
    return %c0_i32, %c0_i32_0 : i32, i32
  }
  func.func @transform_4(%arg0: i32) -> (i32, i32) {
    %c0_i32 = arith.constant 0 : i32
    %c0_i32_0 = arith.constant 0 : i32
    %c0_i32_1 = arith.constant 0 : i32
    return %c0_i32, %c0_i32_0 : i32, i32
  }
  func.func @transform_5(%arg0: i32) -> (i32, i32) {
    %c0_i32 = arith.constant 0 : i32
    %c0_i32_0 = arith.constant 0 : i32
    %c0_i32_1 = arith.constant 0 : i32
    return %c0_i32, %c0_i32_0 : i32, i32
  }
  func.func @transform_6(%arg0: i32) -> (i32, i32) {
    %c0_i32 = arith.constant 0 : i32
    %c0_i32_0 = arith.constant 0 : i32
    %c0_i32_1 = arith.constant 0 : i32
    return %c0_i32, %c0_i32_0 : i32, i32
  }
  func.func @transform_7(%arg0: i32) -> (i32, i32) {
    %c0_i32 = arith.constant 0 : i32
    %c0_i32_0 = arith.constant 0 : i32
    return %arg0, %c0_i32 : i32, i32
  }
}

</mosaic_0001>

<bundles_post_ra>
// kernel: dqn_forward.3
= control target key start
LH: loop header
LB: loop body
LE: loop exit
PB: predicated region body
PF: predicated region fallthrough
CT: control target
= control target key end

     0   :  { %vm19_vm0 = vcmask 261120   ;;  %v735_v32 = vmov 0.0   ;;  %vm528_vm1 = vcmask 257024   ;;  %s969_s1 = inlined_call_operand.vmem [shape: bf16[256,32], index: 1, kind: input, shape index: {}]   ;;  %s970_s0 = inlined_call_operand.vmem [shape: bf16[128,256], index: 0, kind: input, shape index: {}]   ;;  %s971_s2 = inlined_call_operand.vmem [shape: f32[1,32], index: 2, kind: input, shape index: {}]   ;;  %s972_s3 = inlined_call_operand.vmem [shape: bf16[128,32], index: 3, kind: output, shape index: {}]  }
   0x1   :  { %v695_v0 = vld [vmem:[%s969_s1 + $0x40] sm:$0xff]   ;;  %v697_v2 = vld [vmem:[%s969_s1 + $0x48] sm:$0xff]   ;;  %v699_v4 = vld [vmem:[%s969_s1 + $0x50] sm:$0xff]   ;;  %20 = vst.msk [vmem:[#allocation2] sm:$0xff] %vm19_vm0, %v735_v32 }
   0x2   :  { %v696_v1 = vld [vmem:[%s969_s1] sm:$0xff]   ;;  %614 = vmatprep.subr.bf16.mxu0 %v695_v0  ;;  %678 = vmatprep.subr.bf16.mxu1 %v695_v0  ;;  %v698_v3 = vld [vmem:[%s969_s1 + $0x8] sm:$0xff]   ;;  %v700_v5 = vld [vmem:[%s969_s1 + $0x10] sm:$0xff]   ;;  %21 = vst.msk [vmem:[#allocation2 + $0x8] sm:$0xff] %vm19_vm0, %v735_v32 }
   0x3   :  { %615 = vmatpush3.bf16.msra.mxu0 %v696_v1  ;;  %686 = vmatpush3.bf16.msra.mxu1 %v696_v1  ;;  %v701_v6 = vld [vmem:[%s969_s1 + $0x58] sm:$0xff]   ;;  %v703_v8 = vld [vmem:[%s969_s1 + $0x60] sm:$0xff]   ;;  %v705_v10 = vld [vmem:[%s969_s1 + $0x68] sm:$0xff]   ;;  %22 = vst.msk [vmem:[#allocation2 + $0x10] sm:$0xff] %vm19_vm0, %v735_v32 }
   0x4   :  { %616 = vmatprep.subr.bf16.mxu0 %v697_v2  ;;  %679 = vmatprep.subr.bf16.mxu1 %v697_v2  ;;  %v702_v7 = vld [vmem:[%s969_s1 + $0x18] sm:$0xff]   ;;  %v704_v9 = vld [vmem:[%s969_s1 + $0x20] sm:$0xff]   ;;  %v706_v13 = vld [vmem:[%s969_s1 + $0x28] sm:$0xff]   ;;  %23 = vst.msk [vmem:[#allocation2 + $0x18] sm:$0xff] %vm19_vm0, %v735_v32 }
   0x5   :  { %v713_v11 = vld [vmem:[%s970_s0 + $0x4] ss:$8 sps:$4 sm:$0xff]   ;;  %v707_v14 = vld [vmem:[%s969_s1 + $0x70] sm:$0xff]   ;;  %v709_v16 = vld [vmem:[%s969_s1 + $0x78] sm:$0xff]   ;;  %24 = vst.msk [vmem:[#allocation2 + $0x20] sm:$0xff] %vm19_vm0, %v735_v32 }
   0x6   :  { %v716_v12 = vld [vmem:[%s970_s0 + $0x44] ss:$8 sps:$4 sm:$0xff]   ;;  %308 = vmatprep.mubr.bf16.mxu0 %v713_v11  ;;  %v708_v15 = vld [vmem:[%s969_s1 + $0x30] sm:$0xff]   ;;  %v710_v17 = vld [vmem:[%s969_s1 + $0x38] sm:$0xff]   ;;  %25 = vst.msk [vmem:[#allocation2 + $0x28] sm:$0xff] %vm19_vm0, %v735_v32 }
   0x7   :  { %617 = vmatpush3.bf16.msra.mxu0 %v698_v3  ;;  %687 = vmatpush3.bf16.msra.mxu1 %v698_v3  ;;  %v711_v18 = vld [vmem:[%s970_s0] ss:$8 sps:$4 sm:$0xff]   ;;  %v717_v20 = vld [vmem:[%s970_s0 + $0x14] ss:$8 sps:$4 sm:$0xff]   ;;  %v721_v22 = vld [vmem:[%s970_s0 + $0x10] ss:$8 sps:$4 sm:$0xff]  }
   0x8   :  { %618 = vmatprep.subr.bf16.mxu0 %v699_v4  ;;  %680 = vmatprep.subr.bf16.mxu1 %v699_v4  ;;  %v714_v19 = vld [vmem:[%s970_s0 + $0x40] ss:$8 sps:$4 sm:$0xff]   ;;  %v719_v21 = vld [vmem:[%s970_s0 + $0x54] ss:$8 sps:$4 sm:$0xff]   ;;  %v722_v23 = vld [vmem:[%s970_s0 + $0x50] ss:$8 sps:$4 sm:$0xff]  }
   0x9   :  { %340 = vmatprep.mubr.bf16.mxu1 %v716_v12  ;;  %v723_v24 = vld [vmem:[%s970_s0 + $0x24] ss:$8 sps:$4 sm:$0xff]   ;;  %v727_v26 = vld [vmem:[%s970_s0 + $0x20] ss:$8 sps:$4 sm:$0xff]   ;;  %v729_v28 = vld [vmem:[%s970_s0 + $0x34] ss:$8 sps:$4 sm:$0xff]  }
   0xa   :  { %v725_v25 = vld [vmem:[%s970_s0 + $0x64] ss:$8 sps:$4 sm:$0xff]   ;;  %v728_v27 = vld [vmem:[%s970_s0 + $0x60] ss:$8 sps:$4 sm:$0xff]   ;;  %v731_v29 = vld [vmem:[%s970_s0 + $0x74] ss:$8 sps:$4 sm:$0xff]  }
   0xb   :  { %619 = vmatpush3.bf16.msra.mxu0 %v700_v5  ;;  %688 = vmatpush3.bf16.msra.mxu1 %v700_v5  ;;  %v733_v30 = vld [vmem:[%s970_s0 + $0x30] ss:$8 sps:$4 sm:$0xff]   ;;  %26 = vst.msk [vmem:[#allocation2 + $0x30] sm:$0xff] %vm19_vm0, %v735_v32  ;;  %27 = vst.msk [vmem:[#allocation2 + $0x38] sm:$0xff] %vm19_vm0, %v735_v32  ;;  %v36_v35 = vld [vmem:[#allocation2] sm:$0xff] }
   0xc   :  { %620 = vmatprep.subr.bf16.mxu0 %v701_v6  ;;  %681 = vmatprep.subr.bf16.mxu1 %v701_v6  ;;  %v734_v31 = vld [vmem:[%s970_s0 + $0x70] ss:$8 sps:$4 sm:$0xff]   ;;  %28 = vst.msk [vmem:[#allocation2 + $0x40] sm:$0xff] %vm19_vm0, %v735_v32  ;;  %29 = vst.msk [vmem:[#allocation2 + $0x48] sm:$0xff] %vm19_vm0, %v735_v32  ;;  %v37_v43 = vld [vmem:[#allocation2 + $0x8] sm:$0xff] }
   0xd   :  { %30 = vst.msk [vmem:[#allocation2 + $0x50] sm:$0xff] %vm19_vm0, %v735_v32  ;;  %31 = vst.msk [vmem:[#allocation2 + $0x58] sm:$0xff] %vm19_vm0, %v735_v32  ;;  %v38_v55 = vld [vmem:[#allocation2 + $0x10] sm:$0xff]  ;;  %v875_v63 = vld [vmem:[%s971_s2] ss:$0 sm:$0xff] }
   0xe   :  { %32 = vst.msk [vmem:[#allocation2 + $0x60] sm:$0xff] %vm19_vm0, %v735_v32  ;;  %33 = vst.msk [vmem:[#allocation2 + $0x68] sm:$0xff] %vm19_vm0, %v735_v32  ;;  %v39_v0 = vld [vmem:[#allocation2 + $0x18] sm:$0xff] }
   0xf   :  { %621 = vmatpush3.bf16.msra.mxu0 %v702_v7  ;;  %689 = vmatpush3.bf16.msra.mxu1 %v702_v7  ;;  %34 = vst.msk [vmem:[#allocation2 + $0x70] sm:$0xff] %vm19_vm0, %v735_v32  ;;  %35 = vst.msk [vmem:[#allocation2 + $0x78] sm:$0xff] %vm19_vm0, %v735_v32 }
  0x10   :  { %622 = vmatprep.subr.bf16.mxu0 %v703_v8  ;;  %682 = vmatprep.subr.bf16.mxu1 %v703_v8 }
  0x13   :  { %623 = vmatpush3.bf16.msra.mxu0 %v704_v9  ;;  %690 = vmatpush3.bf16.msra.mxu1 %v704_v9  ;;  %v44_v37 = vld [vmem:[#allocation2 + $0x40] sm:$0xff]  ;;  %v45_v45 = vld [vmem:[#allocation2 + $0x48] sm:$0xff] }
  0x14   :  { %624 = vmatprep.subr.bf16.mxu0 %v705_v10  ;;  %683 = vmatprep.subr.bf16.mxu1 %v705_v10  ;;  %v46_v57 = vld [vmem:[#allocation2 + $0x50] sm:$0xff]  ;;  %v47_v2 = vld [vmem:[#allocation2 + $0x58] sm:$0xff] }
  0x17   :  { %625 = vmatpush3.bf16.msra.mxu0 %v706_v13  ;;  %691 = vmatpush3.bf16.msra.mxu1 %v706_v13 }
  0x18   :  { %626 = vmatprep.subr.bf16.mxu0 %v707_v14  ;;  %684 = vmatprep.subr.bf16.mxu1 %v707_v14 }
  0x1b   :  { %627 = vmatpush3.bf16.msra.mxu0 %v708_v15  ;;  %692 = vmatpush3.bf16.msra.mxu1 %v708_v15 }
  0x1c   :  { %628 = vmatprep.subr.bf16.mxu0 %v709_v16  ;;  %685 = vmatprep.subr.bf16.mxu1 %v709_v16 }
  0x1f   :  { %629 = vmatpush3.bf16.msra.mxu0 %v710_v17  ;;  %693 = vmatpush3.bf16.msra.mxu1 %v710_v17 }
  0x22   :  { %309 = vmatmul.mubr.bf16.vlgmr.msra.gmra.mrb[0].mxu0 %v711_v18  ;;  %341 = vmatmul.mubr.bf16.vlgmr.msra.gmra.mrb[0].mxu1 %v714_v19 }
  0x23   :  { %316 = vmatprep.mubr.bf16.mxu0 %v717_v20  ;;  %348 = vmatprep.mubr.bf16.mxu1 %v719_v21 }
  0x2a   :  { %317 = vmatmul.mubr.bf16.gmra.mrb[4].mxu0 %v721_v22  ;;  %349 = vmatmul.mubr.bf16.gmra.mrb[4].mxu1 %v722_v23 }
  0x2b   :  { %324 = vmatprep.mubr.bf16.mxu0 %v723_v24  ;;  %356 = vmatprep.mubr.bf16.mxu1 %v725_v25 }
  0x32   :  { %325 = vmatmul.mubr.bf16.gmra.mrb[8].mxu0 %v727_v26  ;;  %357 = vmatmul.mubr.bf16.gmra.mrb[8].mxu1 %v728_v27 }
  0x33   :  { %332 = vmatprep.mubr.bf16.mxu0 %v729_v28  ;;  %364 = vmatprep.mubr.bf16.mxu1 %v731_v29  ;;  %v40_v28 = vld [vmem:[#allocation2 + $0x20] sm:$0xff] }
  0x34   :  { %v48_v29 = vld [vmem:[#allocation2 + $0x60] sm:$0xff] }
  0x3a   :  { %333 = vmatmul.mubr.bf16.gmra.mrb[12].mxu0 %v733_v30  ;;  %365 = vmatmul.mubr.bf16.gmra.mrb[12].mxu1 %v734_v31 }
  0xf5   :  { %v630_v33 = vpop.f32.mrb[0].mxu0  ;;  %v654_v34 = vpop.f32.mrb[0].mxu1 }
  0xf6   :  { %v631_v36 = vpop.f32.mrb[1].mxu0  ;;  %v655_v38 = vpop.f32.mrb[1].mxu1 }
  0xf7   :  { %v632_v39 = vadd.f32 %v631_v36, %v630_v33  ;;  %v656_v40 = vadd.f32 %v655_v38, %v654_v34  ;;  %v633_v41 = vpop.f32.mrb[2].mxu0  ;;  %v657_v42 = vpop.f32.mrb[2].mxu1  ;;  %v41_v34 = vld [vmem:[#allocation2 + $0x28] sm:$0xff] }
  0xf8   :  { %v634_v44 = vpop.f32.mrb[3].mxu0  ;;  %v658_v46 = vpop.f32.mrb[3].mxu1  ;;  %v49_v36 = vld [vmem:[#allocation2 + $0x68] sm:$0xff] }
  0xf9   :  { %v373_v47 = vadd.f32 %v632_v39, %v36_v35  ;;  %v381_v48 = vadd.f32 %v656_v40, %v44_v37  ;;  %v635_v49 = vadd.f32 %v634_v44, %v633_v41  ;;  %v659_v50 = vadd.f32 %v658_v46, %v657_v42 }
  0xfb   :  { %390 = vst.msk [vmem:[#allocation2] sm:$0xff] %vm19_vm0, %v373_v47  ;;  %398 = vst.msk [vmem:[#allocation2 + $0x40] sm:$0xff] %vm19_vm0, %v381_v48  ;;  %v374_v51 = vadd.f32 %v635_v49, %v37_v43  ;;  %v382_v52 = vadd.f32 %v659_v50, %v45_v45 }
  0xfd   :  { %391 = vst.msk [vmem:[#allocation2 + $0x8] sm:$0xff] %vm19_vm0, %v374_v51  ;;  %399 = vst.msk [vmem:[#allocation2 + $0x48] sm:$0xff] %vm19_vm0, %v382_v52  ;;  %v636_v53 = vpop.f32.mrb[4].mxu0  ;;  %v660_v54 = vpop.f32.mrb[4].mxu1 }
  0xfe   :  { %v637_v56 = vpop.f32.mrb[5].mxu0  ;;  %v661_v58 = vpop.f32.mrb[5].mxu1 }
  0xff   :  { %v638_v59 = vadd.f32 %v637_v56, %v636_v53  ;;  %v662_v60 = vadd.f32 %v661_v58, %v660_v54  ;;  %v639_v61 = vpop.f32.mrb[6].mxu0  ;;  %v663_v62 = vpop.f32.mrb[6].mxu1 }
 0x100   :  { %v640_v1 = vpop.f32.mrb[7].mxu0  ;;  %v664_v3 = vpop.f32.mrb[7].mxu1 }
 0x101   :  { %v375_v4 = vadd.f32 %v638_v59, %v38_v55  ;;  %v383_v5 = vadd.f32 %v662_v60, %v46_v57  ;;  %v641_v6 = vadd.f32 %v640_v1, %v639_v61  ;;  %v665_v7 = vadd.f32 %v664_v3, %v663_v62  ;;  %v42_v1 = vld [vmem:[#allocation2 + $0x30] sm:$0xff] }
 0x102   :  { %v409_v8 = vld [vmem:[#allocation2] sm:$0xff] }
 0x103   :  { %v417_v9 = vld [vmem:[#allocation2 + $0x40] sm:$0xff]  ;;  %v432_v10 = vadd.f32 %v875_v63, %v409_v8  ;;  %392 = vst.msk [vmem:[#allocation2 + $0x10] sm:$0xff] %vm19_vm0, %v375_v4  ;;  %400 = vst.msk [vmem:[#allocation2 + $0x50] sm:$0xff] %vm19_vm0, %v383_v5  ;;  %v376_v12 = vadd.f32 %v641_v6, %v39_v0  ;;  %v384_v13 = vadd.f32 %v665_v7, %v47_v2  ;;  %v50_v2 = vld [vmem:[#allocation2 + $0x70] sm:$0xff] }
 0x104   :  { %v440_v11 = vadd.f32 %v875_v63, %v417_v9  ;;  %v410_v14 = vld [vmem:[#allocation2 + $0x8] sm:$0xff]  ;;  %v43_v7 = vld [vmem:[#allocation2 + $0x38] sm:$0xff] }
 0x105   :  { %v418_v15 = vld [vmem:[#allocation2 + $0x48] sm:$0xff]  ;;  %v448_v16 = vmax.f32 %v432_v10, 0.0  ;;  %v433_v18 = vadd.f32 %v875_v63, %v410_v14  ;;  %393 = vst.msk [vmem:[#allocation2 + $0x18] sm:$0xff] %vm19_vm0, %v376_v12  ;;  %401 = vst.msk [vmem:[#allocation2 + $0x58] sm:$0xff] %vm19_vm0, %v384_v13  ;;  %v642_v20 = vpop.f32.mrb[8].mxu0  ;;  %v666_v21 = vpop.f32.mrb[8].mxu1 }
 0x106   :  { %v456_v17 = vmax.f32 %v440_v11, 0.0  ;;  %v441_v19 = vadd.f32 %v875_v63, %v418_v15  ;;  %v643_v22 = vpop.f32.mrb[9].mxu0  ;;  %v667_v23 = vpop.f32.mrb[9].mxu1  ;;  %v51_v9 = vld [vmem:[#allocation2 + $0x78] sm:$0xff] }
 0x107   :  { %v598_v24 = vpack.c.bf16 %v448_v16, %v448_v16  ;;  %v449_v26 = vmax.f32 %v433_v18, 0.0  ;;  %v645_v30 = vpop.f32.mrb[10].mxu0  ;;  %v669_v31 = vpop.f32.mrb[10].mxu1  ;;  %v644_v32 = vadd.f32 %v643_v22, %v642_v20  ;;  %v668_v33 = vadd.f32 %v667_v23, %v666_v21 }
 0x108   :  { %v606_v25 = vpack.c.bf16 %v456_v17, %v456_v17  ;;  %v457_v27 = vmax.f32 %v441_v19, 0.0  ;;  %v646_v35 = vpop.f32.mrb[11].mxu0  ;;  %v670_v37 = vpop.f32.mrb[11].mxu1 }
 0x109   :  { %529 = vst.msk [vmem:[%s972_s3] sm:$0xf] %vm528_vm1, %v598_v24  ;;  %v599_v38 = vpack.c.bf16 %v449_v26, %v449_v26  ;;  %v647_v40 = vadd.f32 %v646_v35, %v645_v30  ;;  %v671_v41 = vadd.f32 %v670_v37, %v669_v31  ;;  %v377_v44 = vadd.f32 %v644_v32, %v40_v28 }
 0x10a   :  { %537 = vst.msk [vmem:[%s972_s3 + $0x20] sm:$0xf] %vm528_vm1, %v606_v25  ;;  %v607_v39 = vpack.c.bf16 %v457_v27, %v457_v27  ;;  %v411_v42 = vld [vmem:[#allocation2 + $0x10] sm:$0xff]  ;;  %v385_v45 = vadd.f32 %v668_v33, %v48_v29 }
 0x10b   :  { %v419_v43 = vld [vmem:[#allocation2 + $0x50] sm:$0xff]  ;;  %530 = vst.msk [vmem:[%s972_s3 + $0x4] sm:$0xf] %vm528_vm1, %v599_v38  ;;  %v434_v46 = vadd.f32 %v875_v63, %v411_v42  ;;  %v378_v48 = vadd.f32 %v647_v40, %v41_v34  ;;  %v386_v49 = vadd.f32 %v671_v41, %v49_v36 }
 0x10c   :  { %538 = vst.msk [vmem:[%s972_s3 + $0x24] sm:$0xf] %vm528_vm1, %v607_v39  ;;  %v442_v47 = vadd.f32 %v875_v63, %v419_v43  ;;  %v412_v50 = vld [vmem:[#allocation2 + $0x18] sm:$0xff] }
 0x10d   :  { %v420_v51 = vld [vmem:[#allocation2 + $0x58] sm:$0xff]  ;;  %394 = vst.msk [vmem:[#allocation2 + $0x20] sm:$0xff] %vm19_vm0, %v377_v44  ;;  %402 = vst.msk [vmem:[#allocation2 + $0x60] sm:$0xff] %vm19_vm0, %v385_v45  ;;  %v450_v52 = vmax.f32 %v434_v46, 0.0  ;;  %v435_v54 = vadd.f32 %v875_v63, %v412_v50  ;;  %v648_v56 = vpop.f32.mrb[12].mxu0  ;;  %v672_v57 = vpop.f32.mrb[12].mxu1 }
 0x10e   :  { %v458_v53 = vmax.f32 %v442_v47, 0.0  ;;  %v443_v55 = vadd.f32 %v875_v63, %v420_v51  ;;  %395 = vst.msk [vmem:[#allocation2 + $0x28] sm:$0xff] %vm19_vm0, %v378_v48  ;;  %403 = vst.msk [vmem:[#allocation2 + $0x68] sm:$0xff] %vm19_vm0, %v386_v49  ;;  %v649_v58 = vpop.f32.mrb[13].mxu0  ;;  %v673_v59 = vpop.f32.mrb[13].mxu1 }
 0x10f   :  { %v600_v60 = vpack.c.bf16 %v450_v52, %v450_v52  ;;  %v451_v62 = vmax.f32 %v435_v54, 0.0  ;;  %v651_v3 = vpop.f32.mrb[14].mxu0  ;;  %v675_v4 = vpop.f32.mrb[14].mxu1  ;;  %v650_v5 = vadd.f32 %v649_v58, %v648_v56  ;;  %v674_v6 = vadd.f32 %v673_v59, %v672_v57 }
 0x110   :  { %v608_v61 = vpack.c.bf16 %v458_v53, %v458_v53  ;;  %v459_v0 = vmax.f32 %v443_v55, 0.0  ;;  %v652_v8 = vpop.f32.mrb[15].mxu0  ;;  %v676_v10 = vpop.f32.mrb[15].mxu1 }
 0x111   :  { %531 = vst.msk [vmem:[%s972_s3 + $0x8] sm:$0xf] %vm528_vm1, %v600_v60  ;;  %v601_v11 = vpack.c.bf16 %v451_v62, %v451_v62  ;;  %v653_v13 = vadd.f32 %v652_v8, %v651_v3  ;;  %v677_v14 = vadd.f32 %v676_v10, %v675_v4  ;;  %v379_v15 = vadd.f32 %v650_v5, %v42_v1 }
 0x112   :  { %539 = vst.msk [vmem:[%s972_s3 + $0x28] sm:$0xf] %vm528_vm1, %v608_v61  ;;  %v609_v12 = vpack.c.bf16 %v459_v0, %v459_v0  ;;  %v387_v16 = vadd.f32 %v674_v6, %v50_v2 }
 0x113   :  { %532 = vst.msk [vmem:[%s972_s3 + $0xc] sm:$0xf] %vm528_vm1, %v601_v11  ;;  %v380_v19 = vadd.f32 %v653_v13, %v43_v7  ;;  %v388_v20 = vadd.f32 %v677_v14, %v51_v9 }
 0x114   :  { %540 = vst.msk [vmem:[%s972_s3 + $0x2c] sm:$0xf] %vm528_vm1, %v609_v12  ;;  %v413_v17 = vld [vmem:[#allocation2 + $0x20] sm:$0xff] }
 0x115   :  { %v421_v18 = vld [vmem:[#allocation2 + $0x60] sm:$0xff]  ;;  %v436_v21 = vadd.f32 %v875_v63, %v413_v17  ;;  %v414_v23 = vld [vmem:[#allocation2 + $0x28] sm:$0xff]  ;;  %396 = vst.msk [vmem:[#allocation2 + $0x30] sm:$0xff] %vm19_vm0, %v379_v15  ;;  %404 = vst.msk [vmem:[#allocation2 + $0x70] sm:$0xff] %vm19_vm0, %v387_v16 }
 0x116   :  { %v444_v22 = vadd.f32 %v875_v63, %v421_v18  ;;  %v422_v24 = vld [vmem:[#allocation2 + $0x68] sm:$0xff]  ;;  %v437_v25 = vadd.f32 %v875_v63, %v414_v23  ;;  %397 = vst.msk [vmem:[#allocation2 + $0x38] sm:$0xff] %vm19_vm0, %v380_v19  ;;  %405 = vst.msk [vmem:[#allocation2 + $0x78] sm:$0xff] %vm19_vm0, %v388_v20 }
 0x117   :  { %v445_v26 = vadd.f32 %v875_v63, %v422_v24  ;;  %v452_v27 = vmax.f32 %v436_v21, 0.0 }
 0x118   :  { %v460_v28 = vmax.f32 %v444_v22, 0.0  ;;  %v453_v29 = vmax.f32 %v437_v25, 0.0 }
 0x119   :  { %v461_v30 = vmax.f32 %v445_v26, 0.0  ;;  %v602_v31 = vpack.c.bf16 %v452_v27, %v452_v27 }
 0x11a   :  { %v610_v32 = vpack.c.bf16 %v460_v28, %v460_v28  ;;  %v603_v33 = vpack.c.bf16 %v453_v29, %v453_v29 }
 0x11b   :  { %v611_v34 = vpack.c.bf16 %v461_v30, %v461_v30  ;;  %533 = vst.msk [vmem:[%s972_s3 + $0x10] sm:$0xf] %vm528_vm1, %v602_v31 }
 0x11c   :  { %541 = vst.msk [vmem:[%s972_s3 + $0x30] sm:$0xf] %vm528_vm1, %v610_v32  ;;  %534 = vst.msk [vmem:[%s972_s3 + $0x14] sm:$0xf] %vm528_vm1, %v603_v33  ;;  %v415_v35 = vld [vmem:[#allocation2 + $0x30] sm:$0xff] }
 0x11d   :  { %542 = vst.msk [vmem:[%s972_s3 + $0x34] sm:$0xf] %vm528_vm1, %v611_v34  ;;  %v423_v36 = vld [vmem:[#allocation2 + $0x70] sm:$0xff]  ;;  %v438_v37 = vadd.f32 %v875_v63, %v415_v35  ;;  %v416_v39 = vld [vmem:[#allocation2 + $0x38] sm:$0xff] }
 0x11e   :  { %v446_v38 = vadd.f32 %v875_v63, %v423_v36  ;;  %v424_v40 = vld [vmem:[#allocation2 + $0x78] sm:$0xff]  ;;  %v439_v41 = vadd.f32 %v875_v63, %v416_v39 }
 0x11f   :  { %v447_v42 = vadd.f32 %v875_v63, %v424_v40  ;;  %v454_v43 = vmax.f32 %v438_v37, 0.0 }
 0x120   :  { %v462_v44 = vmax.f32 %v446_v38, 0.0  ;;  %v455_v45 = vmax.f32 %v439_v41, 0.0 }
 0x121   :  { %v463_v46 = vmax.f32 %v447_v42, 0.0  ;;  %v604_v47 = vpack.c.bf16 %v454_v43, %v454_v43 }
 0x122   :  { %v612_v48 = vpack.c.bf16 %v462_v44, %v462_v44  ;;  %v605_v49 = vpack.c.bf16 %v455_v45, %v455_v45 }
 0x123   :  { %v613_v50 = vpack.c.bf16 %v463_v46, %v463_v46  ;;  %535 = vst.msk [vmem:[%s972_s3 + $0x18] sm:$0xf] %vm528_vm1, %v604_v47 }
 0x124   :  { %543 = vst.msk [vmem:[%s972_s3 + $0x38] sm:$0xf] %vm528_vm1, %v612_v48  ;;  %536 = vst.msk [vmem:[%s972_s3 + $0x1c] sm:$0xf] %vm528_vm1, %v605_v49 }
 0x125   :  { %544 = vst.msk [vmem:[%s972_s3 + $0x3c] sm:$0xf] %vm528_vm1, %v613_v50 }

// kernel: dqn_forward.4
= control target key start
LH: loop header
LB: loop body
LE: loop exit
PB: predicated region body
PF: predicated region fallthrough
CT: control target
= control target key end

     0   :  { %vm19_vm0 = vcmask 523264   ;;  %v614_v42 = vmov 0.0   ;;  %vm22_vm1 = vcmask 517120   ;;  %vm459_vm2 = vcmask 519168   ;;  %s767_s1 = inlined_call_operand.vmem [shape: bf16[512,64], index: 1, kind: input, shape index: {}]   ;;  %s768_s0 = inlined_call_operand.vmem [shape: bf16[18,512], index: 0, kind: input, shape index: {}]   ;;  %s769_s2 = inlined_call_operand.vmem [shape: f32[1,64], index: 2, kind: input, shape index: {}]   ;;  %s770_s3 = inlined_call_operand.vmem [shape: bf16[18,64], index: 3, kind: output, shape index: {}]  }
   0x1   :  { %v572_v0 = vld [vmem:[%s767_s1 + $0x40] sm:$0xff]   ;;  %v576_v4 = vld [vmem:[%s767_s1 + $0x48] sm:$0xff]   ;;  %v580_v8 = vld [vmem:[%s767_s1 + $0x50] sm:$0xff]   ;;  %20 = vst.msk [vmem:[#allocation2] sm:$0xff] %vm19_vm0, %v614_v42  ;;  %vm462_vm3 = vcmask 516096  }
   0x2   :  { %v573_v1 = vld [vmem:[%s767_s1 + $0xc0] sm:$0xff]   ;;  %515 = vmatprep.subr.bf16.mxu0 %v572_v0  ;;  %v577_v5 = vld [vmem:[%s767_s1 + $0xc8] sm:$0xff]   ;;  %v581_v9 = vld [vmem:[%s767_s1 + $0xd0] sm:$0xff]   ;;  %21 = vst.msk [vmem:[#allocation2 + $0x8] sm:$0xff] %vm19_vm0, %v614_v42 }
   0x3   :  { %v574_v2 = vld [vmem:[%s767_s1] sm:$0xff]   ;;  %543 = vmatprep.subr.bf16.mxu1 %v573_v1  ;;  %v578_v6 = vld [vmem:[%s767_s1 + $0x8] sm:$0xff]   ;;  %v582_v10 = vld [vmem:[%s767_s1 + $0x10] sm:$0xff]   ;;  %23 = vst.msk [vmem:[#allocation2 + $0x10] sm:$0x3] %vm22_vm1, %v614_v42 }
   0x4   :  { %v575_v3 = vld [vmem:[%s767_s1 + $0x80] sm:$0xff]   ;;  %516 = vmatpush3.bf16.msra.mxu0 %v574_v2  ;;  %v579_v7 = vld [vmem:[%s767_s1 + $0x88] sm:$0xff]   ;;  %v583_v11 = vld [vmem:[%s767_s1 + $0x90] sm:$0xff]  }
   0x5   :  { %544 = vmatpush3.bf16.msra.mxu1 %v575_v3  ;;  %517 = vmatprep.subr.bf16.mxu0 %v576_v4  ;;  %v584_v12 = vld [vmem:[%s767_s1 + $0x58] sm:$0xff]   ;;  %v588_v16 = vld [vmem:[%s767_s1 + $0x60] sm:$0xff]   ;;  %v592_v20 = vld [vmem:[%s767_s1 + $0x68] sm:$0xff]  }
   0x6   :  { %545 = vmatprep.subr.bf16.mxu1 %v577_v5  ;;  %v585_v13 = vld [vmem:[%s767_s1 + $0xd8] sm:$0xff]   ;;  %v589_v17 = vld [vmem:[%s767_s1 + $0xe0] sm:$0xff]   ;;  %v593_v21 = vld [vmem:[%s767_s1 + $0xe8] sm:$0xff]  }
   0x7   :  { %v586_v14 = vld [vmem:[%s767_s1 + $0x18] sm:$0xff]   ;;  %v590_v18 = vld [vmem:[%s767_s1 + $0x20] sm:$0xff]   ;;  %v594_v22 = vld [vmem:[%s767_s1 + $0x28] sm:$0xff]  }
   0x8   :  { %518 = vmatpush3.bf16.msra.mxu0 %v578_v6  ;;  %v587_v15 = vld [vmem:[%s767_s1 + $0x98] sm:$0xff]   ;;  %v591_v19 = vld [vmem:[%s767_s1 + $0xa0] sm:$0xff]   ;;  %v595_v23 = vld [vmem:[%s767_s1 + $0xa8] sm:$0xff]  }
   0x9   :  { %546 = vmatpush3.bf16.msra.mxu1 %v579_v7  ;;  %519 = vmatprep.subr.bf16.mxu0 %v580_v8  ;;  %v596_v24 = vld [vmem:[%s767_s1 + $0x70] sm:$0xff]   ;;  %v600_v28 = vld [vmem:[%s767_s1 + $0x78] sm:$0xff]   ;;  %v31_v36 = vld [vmem:[%s768_s0 + $0x20] sm:$0x11] }
   0xa   :  { %547 = vmatprep.subr.bf16.mxu1 %v581_v9  ;;  %v597_v25 = vld [vmem:[%s767_s1 + $0xf0] sm:$0xff]   ;;  %v601_v29 = vld [vmem:[%s767_s1 + $0xf8] sm:$0xff]   ;;  %v473_v37 = vcombine.high %v31_v36, %v31_v36  ;;  %v32_v38 = vld [vmem:[%s768_s0 + $0x28] sm:$0x11]  ;;  %v472_v40 = vcombine.low %v31_v36, %v31_v36 }
   0xb   :  { %v598_v26 = vld [vmem:[%s767_s1 + $0x30] sm:$0xff]   ;;  %v602_v30 = vld [vmem:[%s767_s1 + $0x38] sm:$0xff]   ;;  %v475_v39 = vcombine.high %v32_v38, %v32_v38  ;;  %v474_v41 = vcombine.low %v32_v38, %v32_v38  ;;  %v24_v52 = vld [vmem:[#allocation2] sm:$0xff] }
   0xc   :  { %520 = vmatpush3.bf16.msra.mxu0 %v582_v10  ;;  %v599_v27 = vld [vmem:[%s767_s1 + $0xb0] sm:$0xff]   ;;  %v603_v31 = vld [vmem:[%s767_s1 + $0xb8] sm:$0xff]   ;;  %v25_v57 = vld [vmem:[#allocation2 + $0x8] sm:$0xff] }
   0xd   :  { %548 = vmatpush3.bf16.msra.mxu1 %v583_v11  ;;  %521 = vmatprep.subr.bf16.mxu0 %v584_v12  ;;  %v604_v32 = vld [vmem:[%s768_s0] ss:$16 sps:$4 sm:$0xff]   ;;  %v606_v33 = vld [vmem:[%s768_s0 + $0x4] ss:$16 sps:$4 sm:$0xff]   ;;  %v607_v34 = vld [vmem:[%s768_s0 + $0x8] ss:$16 sps:$4 sm:$0xff]  }
   0xe   :  { %549 = vmatprep.subr.bf16.mxu1 %v585_v13  ;;  %v609_v35 = vld [vmem:[%s768_s0 + $0xc] ss:$16 sps:$4 sm:$0xff]   ;;  %355 = vmatprep.mubr.bf16.mxu0 %v606_v33  ;;  %v26_v6 = vld [vmem:[#allocation2 + $0x10] sm:$0x3]  ;;  %v508_v9 = vld [vmem:[%s769_s2] ss:$0 sm:$0xff] }
   0xf   :  { %403 = vmatprep.mubr.bf16.mxu1 %v609_v35 }
  0x10   :  { %522 = vmatpush3.bf16.msra.mxu0 %v586_v14 }
  0x11   :  { %550 = vmatpush3.bf16.msra.mxu1 %v587_v15  ;;  %523 = vmatprep.subr.bf16.mxu0 %v588_v16 }
  0x12   :  { %551 = vmatprep.subr.bf16.mxu1 %v589_v17 }
  0x14   :  { %524 = vmatpush3.bf16.msra.mxu0 %v590_v18 }
  0x15   :  { %552 = vmatpush3.bf16.msra.mxu1 %v591_v19  ;;  %525 = vmatprep.subr.bf16.mxu0 %v592_v20 }
  0x16   :  { %553 = vmatprep.subr.bf16.mxu1 %v593_v21 }
  0x18   :  { %526 = vmatpush3.bf16.msra.mxu0 %v594_v22 }
  0x19   :  { %554 = vmatpush3.bf16.msra.mxu1 %v595_v23  ;;  %527 = vmatprep.subr.bf16.mxu0 %v596_v24 }
  0x1a   :  { %555 = vmatprep.subr.bf16.mxu1 %v597_v25 }
  0x1c   :  { %528 = vmatpush3.bf16.msra.mxu0 %v598_v26 }
  0x1d   :  { %556 = vmatpush3.bf16.msra.mxu1 %v599_v27  ;;  %529 = vmatprep.subr.bf16.mxu0 %v600_v28 }
  0x1e   :  { %557 = vmatprep.subr.bf16.mxu1 %v601_v29 }
  0x20   :  { %530 = vmatpush3.bf16.msra.mxu0 %v602_v30 }
  0x21   :  { %558 = vmatpush3.bf16.msra.mxu1 %v603_v31 }
  0x23   :  { %356 = vmatmul.mubr.bf16.vlgmr.msra.gmra.mrb[0].mxu0 %v604_v32 }
  0x24   :  { %404 = vmatmul.mubr.bf16.vlgmr.msra.gmra.mrb[0].mxu1 %v607_v34  ;;  %363 = vmatprep.mubr.bf16.mxu0 %v473_v37 }
  0x25   :  { %411 = vmatprep.mubr.bf16.mxu1 %v475_v39 }
  0x2b   :  { %364 = vmatmul.mubr.bf16.gmra.mrb[4].mxu0 %v472_v40 }
  0x2c   :  { %412 = vmatmul.mubr.bf16.gmra.mrb[4].mxu1 %v474_v41 }
  0xf6   :  { %v531_v43 = vpop.f32.mrb[0].mxu0 }
  0xf7   :  { %v559_v44 = vpop.f32.mrb[0].mxu1  ;;  %v532_v45 = vpop.f32.mrb[1].mxu0 }
  0xf8   :  { %v533_v46 = vadd.f32 %v532_v45, %v531_v43  ;;  %v560_v47 = vpop.f32.mrb[1].mxu1  ;;  %v534_v48 = vpop.f32.mrb[2].mxu0 }
  0xf9   :  { %v561_v49 = vadd.f32 %v560_v47, %v559_v44  ;;  %v562_v50 = vpop.f32.mrb[2].mxu1  ;;  %v535_v51 = vpop.f32.mrb[3].mxu0 }
  0xfa   :  { %v536_v53 = vadd.f32 %v535_v51, %v534_v48  ;;  %v563_v54 = vpop.f32.mrb[3].mxu1 }
  0xfb   :  { %v406_v55 = vadd.f32 %v561_v49, %v533_v46  ;;  %v564_v56 = vadd.f32 %v563_v54, %v562_v50 }
  0xfd   :  { %v419_v58 = vadd.f32 %v406_v55, %v24_v52  ;;  %v409_v59 = vadd.f32 %v564_v56, %v536_v53 }
  0xfe   :  { %v537_v60 = vpop.f32.mrb[4].mxu0 }
  0xff   :  { %423 = vst.msk [vmem:[#allocation2] sm:$0xff] %vm19_vm0, %v419_v58  ;;  %v420_v61 = vadd.f32 %v409_v59, %v25_v57  ;;  %v565_v62 = vpop.f32.mrb[4].mxu1  ;;  %v538_v63 = vpop.f32.mrb[5].mxu0 }
 0x100   :  { %v539_v0 = vadd.f32 %v538_v63, %v537_v60  ;;  %v566_v1 = vpop.f32.mrb[5].mxu1  ;;  %v540_v2 = vpop.f32.mrb[6].mxu0 }
 0x101   :  { %424 = vst.msk [vmem:[#allocation2 + $0x8] sm:$0xff] %vm19_vm0, %v420_v61  ;;  %v567_v3 = vadd.f32 %v566_v1, %v565_v62  ;;  %v568_v4 = vpop.f32.mrb[6].mxu1  ;;  %v541_v5 = vpop.f32.mrb[7].mxu0 }
 0x102   :  { %v569_v7 = vpop.f32.mrb[7].mxu1 }
 0x103   :  { %v414_v8 = vadd.f32 %v567_v3, %v539_v0 }
 0x105   :  { %v421_v10 = vadd.f32 %v414_v8, %v26_v6 }
 0x106   :  { %v430_v11 = vld [vmem:[#allocation2] sm:$0xff] }
 0x107   :  { %v440_v12 = vadd.f32 %v508_v9, %v430_v11  ;;  %426 = vst.msk [vmem:[#allocation2 + $0x10] sm:$0x3] %vm22_vm1, %v421_v10 }
 0x108   :  { %v431_v13 = vld [vmem:[#allocation2 + $0x8] sm:$0xff] }
 0x109   :  { %v443_v14 = vmax.f32 %v440_v12, 0.0  ;;  %v441_v15 = vadd.f32 %v508_v9, %v431_v13 }
 0x10b   :  { %v512_v16 = vpack.c.bf16 %v443_v14, %v443_v14  ;;  %v444_v17 = vmax.f32 %v441_v15, 0.0 }
 0x10d   :  { %460 = vst.msk [vmem:[%s770_s3] sm:$0xf] %vm459_vm2, %v512_v16  ;;  %v513_v18 = vpack.c.bf16 %v444_v17, %v444_v17 }
 0x10e   :  { %v432_v19 = vld [vmem:[#allocation2 + $0x10] sm:$0x3] }
 0x10f   :  { %461 = vst.msk [vmem:[%s770_s3 + $0x4] sm:$0xf] %vm459_vm2, %v513_v18  ;;  %v442_v20 = vadd.f32 %v508_v9, %v432_v19 }
 0x111   :  { %v445_v21 = vmax.f32 %v442_v20, 0.0 }
 0x113   :  { %v514_v22 = vpack.c.bf16 %v445_v21, %v445_v21 }
 0x115   :  { %463 = vst.msk [vmem:[%s770_s3 + $0x8] sm:$0x1] %vm462_vm3, %v514_v22 }

// kernel: dqn_forward.5
= control target key start
LH: loop header
LB: loop body
LE: loop exit
PB: predicated region body
PF: predicated region fallthrough
CT: control target
= control target key end

     0   :  { %v113_v29 = vlaneseq  ;;  %v1380_v32 = vmov 1966171168   ;;  %v1381_v36 = vmov 0.0   ;;  %vm1382_vm0 = vmmov 0   ;;  %s1711_s0 = inlined_call_operand.vmem [shape: bf16[2,576], index: 0, kind: input, shape index: {}]   ;;  %s1712_s1 = inlined_call_operand.vmem [shape: bf16[576,64], index: 1, kind: input, shape index: {}]   ;;  %s1713_s2 = inlined_call_operand.vmem [shape: f32[1,64], index: 2, kind: input, shape index: {}]   ;;  %s1714_s3 = inlined_call_operand.vmem [shape: bf16[64,512], index: 3, kind: input, shape index: {}]   ;;  %s1715_s4 = inlined_call_operand.vmem [shape: f32[1,512], index: 4, kind: input, shape index: {}]   ;;  %s1716_s5 = inlined_call_operand.vmem [shape: bf16[512,6], index: 5, kind: input, shape index: {}]   ;;  %s1717_s6 = inlined_call_operand.vmem [shape: f32[1,6], index: 6, kind: input, shape index: {}]   ;;  %s1718_s7 = inlined_call_operand.hbm [shape: f32[2,6], index: 7, kind: output, shape index: {}]  }
   0x1   :  { %v1263_v0 = vld [vmem:[%s1712_s1 + $0x40] sm:$0xff]   ;;  %v1267_v4 = vld [vmem:[%s1712_s1 + $0x48] sm:$0xff]   ;;  %v1271_v8 = vld [vmem:[%s1712_s1 + $0x50] sm:$0xff]   ;;  %v111_v33 = vunpack.c.l.s4 %v1380_v32  ;;  %vm368_vm1 = vcmask 523264  }
   0x2   :  { %v1264_v1 = vld [vmem:[%s1712_s1] sm:$0xff]   ;;  %1153 = vmatprep.subr.bf16.mxu0 %v1263_v0  ;;  %v1268_v5 = vld [vmem:[%s1712_s1 + $0x8] sm:$0xff]   ;;  %v1272_v9 = vld [vmem:[%s1712_s1 + $0x10] sm:$0xff]   ;;  %v1518_v34 = vshrl.u32 %v113_v29, 7 }
   0x3   :  { %v1265_v2 = vld [vmem:[%s1712_s1 + $0xc0] sm:$0xff]   ;;  %1154 = vmatpush3.bf16.msra.mxu0 %v1264_v1  ;;  %v1269_v6 = vld [vmem:[%s1712_s1 + $0xc8] sm:$0xff]   ;;  %v1273_v10 = vld [vmem:[%s1712_s1 + $0xd0] sm:$0xff]   ;;  %v112_v37 = vunpack.c.0.s8 %v111_v33 }
   0x4   :  { %v1266_v3 = vld [vmem:[%s1712_s1 + $0x80] sm:$0xff]   ;;  %1175 = vmatprep.subr.bf16.mxu1 %v1265_v2  ;;  %1155 = vmatprep.subr.bf16.mxu0 %v1267_v4  ;;  %v1270_v7 = vld [vmem:[%s1712_s1 + $0x88] sm:$0xff]   ;;  %v1274_v11 = vld [vmem:[%s1712_s1 + $0x90] sm:$0xff]  }
   0x5   :  { %1176 = vmatpush3.bf16.msra.mxu1 %v1266_v3  ;;  %v1275_v12 = vld [vmem:[%s1712_s1 + $0x58] sm:$0xff]   ;;  %v1279_v16 = vld [vmem:[%s1712_s1 + $0x60] sm:$0xff]   ;;  %v1283_v20 = vld [vmem:[%s1712_s1 + $0x68] sm:$0xff]   ;;  %v115_v39 = vsub.s32 %v112_v37, %v1518_v34 }
   0x6   :  { %1177 = vmatprep.subr.bf16.mxu1 %v1269_v6  ;;  %v1276_v13 = vld [vmem:[%s1712_s1 + $0x18] sm:$0xff]   ;;  %v1280_v17 = vld [vmem:[%s1712_s1 + $0x20] sm:$0xff]   ;;  %v1284_v21 = vld [vmem:[%s1712_s1 + $0x28] sm:$0xff]  }
   0x7   :  { %1156 = vmatpush3.bf16.msra.mxu0 %v1268_v5  ;;  %v1277_v14 = vld [vmem:[%s1712_s1 + $0xd8] sm:$0xff]   ;;  %v1281_v18 = vld [vmem:[%s1712_s1 + $0xe0] sm:$0xff]   ;;  %v1285_v22 = vld [vmem:[%s1712_s1 + $0xe8] sm:$0xff]  }
   0x8   :  { %1157 = vmatprep.subr.bf16.mxu0 %v1271_v8  ;;  %v1278_v15 = vld [vmem:[%s1712_s1 + $0x98] sm:$0xff]   ;;  %v1282_v19 = vld [vmem:[%s1712_s1 + $0xa0] sm:$0xff]   ;;  %v1286_v23 = vld [vmem:[%s1712_s1 + $0xa8] sm:$0xff]  }
   0x9   :  { %1178 = vmatpush3.bf16.msra.mxu1 %v1270_v7  ;;  %v1287_v24 = vld [vmem:[%s1712_s1 + $0x70] sm:$0xff]   ;;  %v1291_v28 = vld [vmem:[%s1712_s1 + $0x78] sm:$0xff]   ;;  %v28_v38 = vld [vmem:[%s1711_s0] sm:$0x1f] }
   0xa   :  { %1179 = vmatprep.subr.bf16.mxu1 %v1273_v10  ;;  %v1288_v25 = vld [vmem:[%s1712_s1 + $0x30] sm:$0xff]   ;;  %v1292_v30 = vld [vmem:[%s1712_s1 + $0x38] sm:$0xff]   ;;  %v116_v40 = vrot.slane %v28_v38, %v115_v39  ;;  %v1296_v43 = vld [vmem:[%s1712_s1 + $0x100] sm:$0xff]   ;;  %v109_v49 = vcombine.high %v28_v38, %v28_v38 }
   0xb   :  { %1158 = vmatpush3.bf16.msra.mxu0 %v1272_v9  ;;  %v1289_v26 = vld [vmem:[%s1712_s1 + $0xf0] sm:$0xff]   ;;  %v1293_v31 = vld [vmem:[%s1712_s1 + $0xf8] sm:$0xff]   ;;  %v1297_v47 = vld [vmem:[%s1712_s1 + $0x108] sm:$0xff]  }
   0xc   :  { %1159 = vmatprep.subr.bf16.mxu0 %v1275_v12  ;;  %v1290_v27 = vld [vmem:[%s1712_s1 + $0xb0] sm:$0xff]   ;;  %v1295_v35 = vld [vmem:[%s1712_s1 + $0xb8] sm:$0xff]   ;;  %v124_v41 = vcombine.high %v116_v40, %v116_v40  ;;  %v131_v42 = vrot.slane %v116_v40, %v115_v39  ;;  %v123_v51 = vrot.slane %v109_v49, %v115_v39 }
   0xd   :  { %1180 = vmatpush3.bf16.msra.mxu1 %v1274_v11  ;;  %v1298_v48 = vld [vmem:[%s1712_s1 + $0x110] sm:$0xff]   ;;  %v1299_v50 = vld [vmem:[%s1712_s1 + $0x118] sm:$0xff]  }
   0xe   :  { %1181 = vmatprep.subr.bf16.mxu1 %v1277_v14  ;;  %v145_v44 = vrot.slane %v124_v41, %v115_v39  ;;  %v146_v45 = vcombine.high %v131_v42, %v131_v42  ;;  %v138_v52 = vrot.slane %v123_v51, %v115_v39 }
   0xf   :  { %1160 = vmatpush3.bf16.msra.mxu0 %v1276_v13 }
  0x10   :  { %1161 = vmatprep.subr.bf16.mxu0 %v1279_v16  ;;  %404 = vmatprep.mubr.bf16.mxu0 %v145_v44  ;;  %v147_v46 = vcombine.high %v145_v44, %v145_v44 }
  0x11   :  { %1182 = vmatpush3.bf16.msra.mxu1 %v1278_v15 }
  0x12   :  { %1183 = vmatprep.subr.bf16.mxu1 %v1281_v18  ;;  %444 = vmatprep.mubr.bf16.mxu1 %v147_v46 }
  0x13   :  { %1162 = vmatpush3.bf16.msra.mxu0 %v1280_v17 }
  0x14   :  { %1163 = vmatprep.subr.bf16.mxu0 %v1283_v20 }
  0x15   :  { %1184 = vmatpush3.bf16.msra.mxu1 %v1282_v19 }
  0x16   :  { %1185 = vmatprep.subr.bf16.mxu1 %v1285_v22 }
  0x17   :  { %1164 = vmatpush3.bf16.msra.mxu0 %v1284_v21 }
  0x18   :  { %1165 = vmatprep.subr.bf16.mxu0 %v1287_v24 }
  0x19   :  { %1186 = vmatpush3.bf16.msra.mxu1 %v1286_v23 }
  0x1a   :  { %1187 = vmatprep.subr.bf16.mxu1 %v1289_v26 }
  0x1b   :  { %1166 = vmatpush3.bf16.msra.mxu0 %v1288_v25 }
  0x1c   :  { %1167 = vmatprep.subr.bf16.mxu0 %v1291_v28 }
  0x1d   :  { %1188 = vmatpush3.bf16.msra.mxu1 %v1290_v27 }
  0x1e   :  { %1189 = vmatprep.subr.bf16.mxu1 %v1293_v31 }
  0x1f   :  { %1168 = vmatpush3.bf16.msra.mxu0 %v1292_v30 }
  0x20   :  { %1246 = vmatprep.subr.bf16.mxu0 %v1381_v36 }
  0x21   :  { %1190 = vmatpush3.bf16.msra.mxu1 %v1295_v35 }
  0x22   :  { %405 = vmatmul.mubr.bf16.vlgmr.msra.gmra.mrb[0].mxu0 %v131_v42 }
  0x23   :  { %1247 = vmatpush3.bf16.msra.mxu0 %v1296_v43  ;;  %1254 = vmatprep.mubr.msk.bf16.mxu0 %vm1382_vm0, %v1381_v36 }
  0x24   :  { %445 = vmatmul.mubr.bf16.vlgmr.msra.gmra.mrb[0].mxu1 %v146_v45  ;;  %1248 = vmatprep.subr.bf16.mxu0 %v1381_v36 }
  0x27   :  { %1249 = vmatpush3.bf16.msra.mxu0 %v1297_v47 }
  0x28   :  { %1250 = vmatprep.subr.bf16.mxu0 %v1381_v36 }
  0x2b   :  { %1251 = vmatpush3.bf16.msra.mxu0 %v1298_v48 }
  0x2c   :  { %1252 = vmatprep.subr.bf16.mxu0 %v1381_v36 }
  0x2f   :  { %1253 = vmatpush3.bf16.msra.mxu0 %v1299_v50 }
  0x32   :  { %1255 = vmatmul.mubr.msk.bf16.vlgmr.msra.gmra.mrb[4].mxu0 %vm368_vm1, %v138_v52 }
  0x33   :  { %12 = vsyncpa [#allocation3], 0  ;;  %v1300_v53 = vld [vmem:[%s1714_s3] ss:$16 sps:$4 sm:$0xff]   ;;  %v1302_v54 = vld [vmem:[%s1714_s3 + $0x4] ss:$16 sps:$4 sm:$0xff]  }
  0x34   :  { %v1303_v55 = vld [vmem:[%s1714_s3 + $0x8] ss:$16 sps:$4 sm:$0xff]   ;;  %v1305_v56 = vld [vmem:[%s1714_s3 + $0xc] ss:$16 sps:$4 sm:$0xff]   ;;  %v1308_v57 = vld [vmem:[%s1714_s3 + $0x24] ss:$16 sps:$4 sm:$0xff]   ;;  %615 = vmatprep.subr.bf16.mxu1 %v1302_v54 }
  0x35   :  { %v1311_v58 = vld [vmem:[%s1714_s3 + $0x2c] ss:$16 sps:$4 sm:$0xff]   ;;  %656 = vmatprep.subr.bf16.mxu0 %v1305_v56  ;;  %616 = vmatpush1.bf16.msra.mxu1 %v1300_v53  ;;  %v1306_v59 = vld [vmem:[%s1714_s3 + $0x20] ss:$16 sps:$4 sm:$0xff]   ;;  %v1309_v60 = vld [vmem:[%s1714_s3 + $0x28] ss:$16 sps:$4 sm:$0xff]  }
  0x36   :  { %657 = vmatpush1.bf16.msra.mxu0 %v1303_v55  ;;  %617 = vmatprep.subr.bf16.mxu1 %v1308_v57  ;;  %v1314_v61 = vld [vmem:[%s1714_s3 + $0x44] ss:$16 sps:$4 sm:$0xff]   ;;  %v1317_v62 = vld [vmem:[%s1714_s3 + $0x4c] ss:$16 sps:$4 sm:$0xff]   ;;  %v1312_v63 = vld [vmem:[%s1714_s3 + $0x40] ss:$16 sps:$4 sm:$0xff]  }
  0x37   :  { %658 = vmatprep.subr.bf16.mxu0 %v1311_v58  ;;  %v1315_v0 = vld [vmem:[%s1714_s3 + $0x48] ss:$16 sps:$4 sm:$0xff]   ;;  %v1320_v1 = vld [vmem:[%s1714_s3 + $0x64] ss:$16 sps:$4 sm:$0xff]   ;;  %v1323_v2 = vld [vmem:[%s1714_s3 + $0x6c] ss:$16 sps:$4 sm:$0xff]  }
  0x38   :  { %v1318_v3 = vld [vmem:[%s1714_s3 + $0x60] ss:$16 sps:$4 sm:$0xff]   ;;  %v1321_v4 = vld [vmem:[%s1714_s3 + $0x68] ss:$16 sps:$4 sm:$0xff]   ;;  %v1383_v5 = vmov 0   ;;  %s1384_s23 = smov [#allocation2]  }
  0x39   :  { %618 = vmatpush1.bf16.msra.mxu1 %v1306_v59  ;;  %647 = vmatprep.mubr.bf16.mxu1 %v1383_v5  ;;  %v1324_v6 = vld [vmem:[%s1716_s5 + $0x40] sm:$0xff]   ;;  %v1328_v30 = vld [vmem:[%s1716_s5 + $0x48] sm:$0xff]   ;;  %v1332_v35 = vld [vmem:[%s1716_s5 + $0x50] sm:$0xff]   ;;  %v514_v59 = vsub.s32 0, %v1518_v34  ;;  %s1056_s24 = sshll.u32 %s1384_s23, 4  ;;  %vm1048_vm2 = vcmask 41984   ;;  %s1057_s24 = int_to_ptr.vmem [resolvable:$true] %s1056_s24 }
  0x3a   :  { %659 = vmatpush1.bf16.msra.mxu0 %v1309_v60  ;;  %619 = vmatprep.subr.bf16.mxu1 %v1314_v61  ;;  %v1325_v7 = vld [vmem:[%s1716_s5 + $0xc0] sm:$0xff]   ;;  %v1329_v31 = vld [vmem:[%s1716_s5 + $0xc8] sm:$0xff]   ;;  %v1333_v36 = vld [vmem:[%s1716_s5 + $0xd0] sm:$0xff]   ;;  %v522_v60 = vsub.s32 2, %v1518_v34  ;;  %s1356_s0 = scalar_lea.vmem %s1057_s24, 32  ;;  %p1361_p1 = scmp.lt.s32.totalorder %s1057_s24, %s1057_s24 }
  0x3b   :  { %660 = vmatprep.subr.bf16.mxu0 %v1317_v62  ;;  %688 = vmatprep.mubr.bf16.mxu0 %v1383_v5  ;;  %v1064_v9 = vld [vmem:[%s1713_s2] ss:$0 sm:$0xff]  ;;  %v1330_v32 = vld [vmem:[%s1716_s5 + $0x8] sm:$0xff]   ;;  %v1334_v37 = vld [vmem:[%s1716_s5 + $0x10] sm:$0xff]   ;;  %v518_v62 = vsub.s32 1, %v1518_v34  ;;  %p1357_p0 = scmp.ne.s32.totalorder %s1057_s24, %s1356_s0  ;;  %p1362_p2 = scmp.lt.s32.totalorder %s1356_s0, %s1356_s0 }
  0x3c   :  { %v1326_v27 = vld [vmem:[%s1716_s5] sm:$0xff]   ;;  %v1331_v33 = vld [vmem:[%s1716_s5 + $0x88] sm:$0xff]   ;;  %v1335_v38 = vld [vmem:[%s1716_s5 + $0x90] sm:$0xff]  }
  0x3d   :  { %620 = vmatpush1.bf16.msra.mxu1 %v1312_v63  ;;  %v1327_v28 = vld [vmem:[%s1716_s5 + $0x80] sm:$0xff]   ;;  %v1336_v39 = vld [vmem:[%s1716_s5 + $0x58] sm:$0xff]   ;;  %v1344_v47 = vld [vmem:[%s1716_s5 + $0x68] sm:$0xff]   ;;  %v526_v63 = vsub.s32 3, %v1518_v34  ;;  %p1363_p3 = por %p1362_p2, %p1361_p1 }
  0x3e   :  { %661 = vmatpush1.bf16.msra.mxu0 %v1315_v0  ;;  %621 = vmatprep.subr.bf16.mxu1 %v1320_v1  ;;  %v1337_v40 = vld [vmem:[%s1716_s5 + $0xd8] sm:$0xff]   ;;  %v1340_v43 = vld [vmem:[%s1716_s5 + $0x60] sm:$0xff]   ;;  %v1345_v48 = vld [vmem:[%s1716_s5 + $0xe8] sm:$0xff]  }
  0x3f   :  { %662 = vmatprep.subr.bf16.mxu0 %v1323_v2  ;;  %v1338_v41 = vld [vmem:[%s1716_s5 + $0x18] sm:$0xff]   ;;  %v1341_v44 = vld [vmem:[%s1716_s5 + $0xe0] sm:$0xff]   ;;  %v1346_v49 = vld [vmem:[%s1716_s5 + $0x28] sm:$0xff]   ;;  %p1364_p4 = pnand %p1363_p3, %p1357_p0 }
  0x40   :  { %v1339_v42 = vld [vmem:[%s1716_s5 + $0x98] sm:$0xff]   ;;  %v1342_v45 = vld [vmem:[%s1716_s5 + $0x20] sm:$0xff]   ;;  %v1347_v50 = vld [vmem:[%s1716_s5 + $0xa8] sm:$0xff]  }
  0x41   :  { %622 = vmatpush1.bf16.msra.mxu1 %v1318_v3  ;;  %v1343_v46 = vld [vmem:[%s1716_s5 + $0xa0] sm:$0xff]   ;;  %v1348_v51 = vld [vmem:[%s1716_s5 + $0x70] sm:$0xff]   ;;  %v1352_v55 = vld [vmem:[%s1716_s5 + $0x78] sm:$0xff]  }
  0x42   :  { %663 = vmatpush1.bf16.msra.mxu0 %v1321_v4  ;;  %1202 = vmatprep.subr.bf16.mxu1 %v1324_v6  ;;  %v1349_v52 = vld [vmem:[%s1716_s5 + $0xf0] sm:$0xff]   ;;  %v1353_v56 = vld [vmem:[%s1716_s5 + $0xf8] sm:$0xff]   ;;  %v510_v61 = vld [vmem:[%s1715_s4] sm:$0xf] }
  0x43   :  { %1224 = vmatprep.subr.bf16.mxu0 %v1325_v7  ;;  %v1350_v53 = vld [vmem:[%s1716_s5 + $0x30] sm:$0xff]   ;;  %v1354_v57 = vld [vmem:[%s1716_s5 + $0x38] sm:$0xff]   ;;  %v515_v0 = vrot.slane %v510_v61, %v514_v59  ;;  %v523_v1 = vrot.slane %v510_v61, %v522_v60  ;;  %v519_v2 = vrot.slane %v510_v61, %v518_v62  ;;  %v527_v3 = vrot.slane %v510_v61, %v526_v63 }
  0x44   :  { %v1351_v54 = vld [vmem:[%s1716_s5 + $0xb0] sm:$0xff]   ;;  %v1355_v58 = vld [vmem:[%s1716_s5 + $0xb8] sm:$0xff]  }
  0xf5   :  { %v1169_v8 = vpop.f32.mrb[0].mxu0 }
  0xf6   :  { %v1170_v10 = vpop.f32.mrb[1].mxu0 }
  0xf7   :  { %v1171_v11 = vadd.f32 %v1170_v10, %v1169_v8  ;;  %v1172_v12 = vpop.f32.mrb[2].mxu0  ;;  %v1191_v13 = vpop.f32.mrb[0].mxu1 }
  0xf8   :  { %v1173_v14 = vpop.f32.mrb[3].mxu0  ;;  %v1192_v15 = vpop.f32.mrb[1].mxu1 }
  0xf9   :  { %v407_v16 = vadd.f32 %v1171_v11, %v1064_v9  ;;  %v1193_v17 = vadd.f32 %v1192_v15, %v1191_v13  ;;  %v1194_v18 = vpop.f32.mrb[2].mxu1 }
  0xfa   :  { %v1195_v19 = vpop.f32.mrb[3].mxu1 }
  0xfb   :  { %v447_v20 = vadd.f32 %v1193_v17, %v407_v16 }
 0x105   :  { %v486_v21 = vpop.f32.mrb[4].mxu0 }
 0x106   :  { %v487_v22 = vadd.f32 %v486_v21, %v447_v20  ;;  %v1256_v23 = vpop.f32.mrb[5].mxu0 }
 0x107   :  { %v489_v24 = vpop.f32.mrb[6].mxu0 }
 0x108   :  { %v492_v25 = vmax.f32 %v487_v22, 0.0  ;;  %v1257_v26 = vpop.f32.mrb[7].mxu0 }
 0x10a   :  { %v493_v29 = vpack.c.bf16 %v492_v25, %v492_v25  ;;  %v1120_v25 = vld [vmem:[%s1717_s6] ss:$0 sm:$0xff] }
 0x10c   :  { %1118 = vmatmul.mubr.msk.bf16.vlgmr.msra.gmra.mrb[4].mxu1 %vm368_vm1, %v493_v29  ;;  %1119 = vmatmul.mubr.msk.bf16.vlgmr.msra.gmra.mrb[8].mxu0 %vm368_vm1, %v493_v29 }
 0x10d   :  { %1203 = vmatpush3.bf16.msra.mxu1 %v1326_v27  ;;  %1225 = vmatpush3.bf16.msra.mxu0 %v1327_v28 }
 0x10e   :  { %1204 = vmatprep.subr.bf16.mxu1 %v1328_v30  ;;  %1226 = vmatprep.subr.bf16.mxu0 %v1329_v31 }
 0x111   :  { %1205 = vmatpush3.bf16.msra.mxu1 %v1330_v32  ;;  %1227 = vmatpush3.bf16.msra.mxu0 %v1331_v33 }
 0x112   :  { %1206 = vmatprep.subr.bf16.mxu1 %v1332_v35  ;;  %1228 = vmatprep.subr.bf16.mxu0 %v1333_v36 }
 0x115   :  { %1207 = vmatpush3.bf16.msra.mxu1 %v1334_v37  ;;  %1229 = vmatpush3.bf16.msra.mxu0 %v1335_v38 }
 0x116   :  { %1208 = vmatprep.subr.bf16.mxu1 %v1336_v39  ;;  %1230 = vmatprep.subr.bf16.mxu0 %v1337_v40 }
 0x119   :  { %1209 = vmatpush3.bf16.msra.mxu1 %v1338_v41  ;;  %1231 = vmatpush3.bf16.msra.mxu0 %v1339_v42 }
 0x11a   :  { %1210 = vmatprep.subr.bf16.mxu1 %v1340_v43  ;;  %1232 = vmatprep.subr.bf16.mxu0 %v1341_v44 }
 0x11d   :  { %1211 = vmatpush3.bf16.msra.mxu1 %v1342_v45  ;;  %1233 = vmatpush3.bf16.msra.mxu0 %v1343_v46 }
 0x11e   :  { %1212 = vmatprep.subr.bf16.mxu1 %v1344_v47  ;;  %1234 = vmatprep.subr.bf16.mxu0 %v1345_v48 }
 0x121   :  { %1213 = vmatpush3.bf16.msra.mxu1 %v1346_v49  ;;  %1235 = vmatpush3.bf16.msra.mxu0 %v1347_v50 }
 0x122   :  { %1214 = vmatprep.subr.bf16.mxu1 %v1348_v51  ;;  %1236 = vmatprep.subr.bf16.mxu0 %v1349_v52 }
 0x125   :  { %1215 = vmatpush3.bf16.msra.mxu1 %v1350_v53  ;;  %1237 = vmatpush3.bf16.msra.mxu0 %v1351_v54 }
 0x126   :  { %1216 = vmatprep.subr.bf16.mxu1 %v1352_v55  ;;  %1238 = vmatprep.subr.bf16.mxu0 %v1353_v56 }
 0x129   :  { %1217 = vmatpush3.bf16.msra.mxu1 %v1354_v57  ;;  %1239 = vmatpush3.bf16.msra.mxu0 %v1355_v58 }
 0x1df   :  { %v649_v4 = vpop.f32.mrb[4].mxu1  ;;  %v690_v5 = vpop.f32.mrb[8].mxu0 }
 0x1e0   :  { %v650_v6 = vadd.f32 %v649_v4, %v515_v0  ;;  %v691_v7 = vadd.f32 %v690_v5, %v523_v1  ;;  %v651_v8 = vpop.f32.mrb[5].mxu1  ;;  %v692_v9 = vpop.f32.mrb[9].mxu0 }
 0x1e1   :  { %v652_v10 = vadd.f32 %v651_v8, %v519_v2  ;;  %v693_v11 = vadd.f32 %v692_v9, %v527_v3  ;;  %v653_v12 = vpop.f32.mrb[6].mxu1  ;;  %v694_v13 = vpop.f32.mrb[10].mxu0 }
 0x1e2   :  { %v697_v14 = vmax.f32 %v650_v6, 0.0  ;;  %v699_v15 = vmax.f32 %v691_v7, 0.0  ;;  %v654_v16 = vpop.f32.mrb[7].mxu1  ;;  %v695_v17 = vpop.f32.mrb[11].mxu0 }
 0x1e3   :  { %v698_v18 = vmax.f32 %v652_v10, 0.0  ;;  %v700_v34 = vmax.f32 %v693_v11, 0.0 }
 0x1e4   :  { %v701_v21 = vpack.c.bf16 %v697_v14, %v697_v14  ;;  %v703_v22 = vpack.c.bf16 %v699_v15, %v699_v15 }
 0x1e5   :  { %v702_v19 = vpack.c.bf16 %v698_v18, %v698_v18  ;;  %v704_v20 = vpack.c.bf16 %v700_v34, %v700_v34 }
 0x1e7   :  { %1000 = vmatprep.mubr.bf16.mxu1 %v702_v19  ;;  %1040 = vmatprep.mubr.bf16.mxu0 %v704_v20 }
 0x1e8   :  { %1001 = vmatmul.mubr.bf16.vlgmr.msra.gmra.mrb[8].mxu1 %v701_v21  ;;  %1041 = vmatmul.mubr.bf16.vlgmr.msra.gmra.mrb[12].mxu0 %v703_v22 }
 0x2bb   :  { %v1218_v23 = vpop.f32.mrb[8].mxu1  ;;  %v1240_v24 = vpop.f32.mrb[12].mxu0 }
 0x2bc   :  { %v1219_v26 = vpop.f32.mrb[9].mxu1  ;;  %v1241_v27 = vpop.f32.mrb[13].mxu0 }
 0x2bd   :  { %v1220_v28 = vadd.f32 %v1219_v26, %v1218_v23  ;;  %v1242_v29 = vadd.f32 %v1241_v27, %v1240_v24  ;;  %v1221_v30 = vpop.f32.mrb[10].mxu1  ;;  %v1243_v31 = vpop.f32.mrb[14].mxu0 }
 0x2be   :  { %v1222_v32 = vpop.f32.mrb[11].mxu1  ;;  %v1244_v33 = vpop.f32.mrb[15].mxu0 }
 0x2bf   :  { %v1003_v35 = vadd.f32 %v1220_v28, %v1120_v25 }
 0x2c1   :  { %v1043_v36 = vadd.f32 %v1242_v29, %v1003_v35 }
 0x2c3   :  { %1049 = vst.msk [vmem:[#allocation2] sm:$0x3] %vm1048_vm2, %v1043_v36 }
 0x2c4   :  { %1367 = shalt.err (!%p1364_p4)
}
 0x2c5   :  { %s1368_s26 = scalar_lea.hbm %s1718_s7, 32 }
 0x2c6   :  { %p1369_p5 = scmp.ne.s32.totalorder %s1718_s7, %s1368_s26  ;;  %p1372_p6 = scmp.lt.u32.totalorder %s1368_s26, %s1718_s7 }
 0x2c8   :  { %p1374_p7 = pnand %p1372_p6, %p1369_p5 }
 0x2ca   :  { %1377 = shalt.err (!%p1374_p7)
}
 0x2cb   :  { %1059 = dma.vmem_to_hbm [thread:$0]  %s1057_s24, 32, %s1718_s7, [#allocation3]  }
 0x2cc   :  { %1378 = dma.done.wait [#allocation3], 32  }
 0x2cd   :  { %1379 = vsyncadd [#allocation3], 4294967264 }
 0x2ce   :  { %1063 = vsyncpa [#allocation3], 1 }

</bundles_post_ra>
